<compile_context>
chip_gen: v5e
topology: v5e:2x2
jax: 0.10.0
libtpu: 0.0.40
codegen_flags: <defaults>
</compile_context>

<pallas_src>
import jax
import jax.numpy as jnp
from jax import lax
from jax.experimental import pallas as pl
from jax.experimental.pallas import tpu as pltpu

_LN10 = 2.302585092994046


# ----------------------------------------------------------------------------
# Fused Pallas kernel (one grid step == one batch element)
# ----------------------------------------------------------------------------
def fused_feature_extractor_kernel(
        x_ref, y_ref, fes_ref, pe_ref, mdim_ref, mind_ref,
        wemb_ref, wfes_ref,
        wa_d_ref, w1_d_ref, w2_d_ref, v_d_ref,
        wa_i_ref, w1_i_ref, w2_i_ref, v_i_ref,
        out_ref):
    H = wemb_ref.shape[1]
    N = pe_ref.shape[0]                    # N = dim * pop_size
    pop = out_ref.shape[1]
    dim = N // pop
    fes_dim = wfes_ref.shape[1]

    # ---- encode_y + EmbeddingNet (Linear 3->H, bias-free) -------------------
    x_col = x_ref[0]                       # (N, 1): x[b, p, d] at row d*pop+p
    y_col = y_ref[0]                       # (N, 1): ys[b, p]   at row d*pop+p
    # TODO(synk): assumes ys != 0 (dense replacement of boolean-mask indexing).
    exponent = jnp.floor(jnp.log(jnp.abs(y_col)) * (1.0 / _LN10))
    mantissa = y_col * jnp.exp(-exponent * _LN10)
    y_enc = mantissa * 0.1
    e_enc = (exponent + 1.0) * (1.0 / 32.0)

    wemb = wemb_ref[...]                   # (3, H)
    h = (x_col * wemb[0:1, :]
         + y_enc * wemb[1:2, :]
         + e_enc * wemb[2:3, :])           # (N, H): rank-1 broadcast sum,
                                           # avoids the K=3 matmul entirely.

    inv_sqrt_h = 1.0 / float(H) ** 0.5

    def encoder_layer(x2, mask, wa_ref, w1_ref, w2_ref, v_ref):
        """Post-norm single-head transformer layer on (N, H) rows.

        `mask` is an additive (N, N) block mask restricting attention to rows
        of the same sequence (same d for the dimension encoder, same p for
        the individual encoder).
        """
        wa = wa_ref[...]                   # (H, 4H) = [Wq | Wk | Wv | Wo]
        vz = v_ref[...]                    # (6, H)  = [b1, b2, g1, be1, g2, be2]

        qkv = jnp.dot(x2, wa[:, :3 * H], preferred_element_type=jnp.float32)
        q = qkv[:, 0 * H:1 * H]
        k = qkv[:, 1 * H:2 * H]
        v = qkv[:, 2 * H:3 * H]

        # q @ k^T without an explicit transpose.
        s = lax.dot_general(q, k, (((1,), (1,)), ((), ())),
                            preferred_element_type=jnp.float32)
        s = s * inv_sqrt_h + mask          # (N, N)
        m = jnp.max(s, axis=-1, keepdims=True)
        p = jnp.exp(s - m)
        attn = p * pl.reciprocal(jnp.sum(p, axis=-1, keepdims=True),
                                 approx=True)
        ctx = jnp.dot(attn, v, preferred_element_type=jnp.float32)     # (N, H)
        mha = jnp.dot(ctx, wa[:, 3 * H:], preferred_element_type=jnp.float32)

        def layer_norm(t, g, b):
            mu = jnp.mean(t, axis=-1, keepdims=True)
            var = jnp.mean(jnp.square(t - mu), axis=-1, keepdims=True)
            return (t - mu) * lax.rsqrt(var + 1e-5) * g + b

        h1 = layer_norm(x2 + mha, vz[2:3, :], vz[3:4, :])
        ff = jnp.dot(h1, w1_ref[...],
                     preferred_element_type=jnp.float32) + vz[0:1, :]
        ff = jnp.maximum(ff, 0.0)
        ff = jnp.dot(ff, w2_ref[...],
                     preferred_element_type=jnp.float32) + vz[1:2, :]
        return layer_norm(h1 + ff, vz[4:5, :], vz[5:6, :])

    # ---- dimension encoder: attention across the population axis -----------
    o_ij = encoder_layer(h, mdim_ref[...],
                         wa_d_ref, w1_d_ref, w2_d_ref, v_d_ref)

    # ---- individual encoder: attention across the dimension axis (+ 0.5*PE)
    o_i = encoder_layer(o_ij + pe_ref[...], mind_ref[...],
                        wa_i_ref, w1_i_ref, w2_i_ref, v_i_ref)

    # ---- mean over dim (rows are ordered r = d*pop + p) ---------------------
    o_sum = o_i[0:pop, :]
    for d in range(1, dim):                # static, tile-aligned sublane slices
        o_sum = o_sum + o_i[d * pop:(d + 1) * pop, :]
    o_mean = o_sum * (1.0 / dim)           # (pop, H)

    # ---- fes embedder (Linear 1->16, bias-free), broadcast over population --
    embed_fes = fes_ref[0] * wfes_ref[...]                 # (1, fes_dim)
    embed_fes = jnp.broadcast_to(embed_fes, (pop, fes_dim))

    out_ref[0] = jnp.concatenate([o_mean, embed_fes], axis=-1)   # (pop, H+16)


# ----------------------------------------------------------------------------
# Positional encoding (constant, built on the XLA side)
# ----------------------------------------------------------------------------
def sinusoid_pe(length, d_model):
    pos = jnp.arange(length, dtype=jnp.float32)[:, None]
    i = jnp.arange(d_model)[None, :]
    angle_rates = jnp.power(10000.0,
                            -(2 * (i // 2)).astype(jnp.float32) / d_model)
    angles = pos * angle_rates
    return jnp.where(i % 2 == 0, jnp.sin(angles), jnp.cos(angles))


# ----------------------------------------------------------------------------
# Forward wrapper: one fused pallas_call
# ----------------------------------------------------------------------------
@jax.jit
def feature_extractor_forward(xs, ys, fes, pp):
    bs, pop, dim = xs.shape
    H = pp["w_emb"].shape[1]
    fes_dim = pp["w_fes"].shape[1]
    N = dim * pop

    # --- cheap layout-only staging (row order r = d*pop + p) ---
    x_flat = jnp.transpose(xs, (0, 2, 1)).reshape(bs, N, 1)
    y_flat = jnp.tile(ys[:, None, :], (1, dim, 1)).reshape(bs, N, 1)
    fes3 = fes.reshape(bs, 1, 1)

    pe_flat = 0.5 * jnp.repeat(sinusoid_pe(dim, H), pop, axis=0)   # (N, H)

    r = jnp.arange(N)
    neg = jnp.float32(-1e9)
    mask_dim = jnp.where((r[:, None] // pop) == (r[None, :] // pop),
                         0.0, neg).astype(jnp.float32)
    mask_ind = jnp.where((r[:, None] % pop) == (r[None, :] % pop),
                         0.0, neg).astype(jnp.float32)

    def const2d(a):
        return pl.BlockSpec(a.shape, lambda b: (0, 0))

    in_specs = [
        pl.BlockSpec((1, N, 1), lambda b: (b, 0, 0)),   # x_flat
        pl.BlockSpec((1, N, 1), lambda b: (b, 0, 0)),   # y_flat
        pl.BlockSpec((1, 1, 1), lambda b: (b, 0, 0)),   # fes
        const2d(pe_flat), const2d(mask_dim), const2d(mask_ind),
        const2d(pp["w_emb"]), const2d(pp["w_fes"]),
        const2d(pp["dim"]["wa"]), const2d(pp["dim"]["w1"]),
        const2d(pp["dim"]["w2"]), const2d(pp["dim"]["vec"]),
        const2d(pp["ind"]["wa"]), const2d(pp["ind"]["w1"]),
        const2d(pp["ind"]["w2"]), const2d(pp["ind"]["vec"]),
    ]

    return pl.pallas_call(
        fused_feature_extractor_kernel,
        out_shape=jax.ShapeDtypeStruct((bs, pop, H + fes_dim), jnp.float32),
        grid=(bs,),
        in_specs=in_specs,
        out_specs=pl.BlockSpec((1, pop, H + fes_dim), lambda b: (b, 0, 0)),
        compiler_params=pltpu.CompilerParams(
            dimension_semantics=("parallel",)),        # shards bs over v7x TCs
    )(x_flat, y_flat, fes3, pe_flat, mask_dim, mask_ind,
      pp["w_emb"], pp["w_fes"],
      pp["dim"]["wa"], pp["dim"]["w1"], pp["dim"]["w2"], pp["dim"]["vec"],
      pp["ind"]["wa"], pp["ind"]["w1"], pp["ind"]["w2"], pp["ind"]["vec"])


# ----------------------------------------------------------------------------
# Parameter init (deterministic, torch.nn.Linear-style uniform), pre-packed
# ----------------------------------------------------------------------------
def _uniform_init(key, fan_in, shape):
    bound = 1.0 / (fan_in ** 0.5)
    return jax.random.uniform(key, shape, jnp.float32, -bound, bound)


def init_encoder_params(key, hidden, ffh):
    ks = jax.random.split(key, 8)
    wq = _uniform_init(ks[0], hidden, (hidden, hidden))
    wk = _uniform_init(ks[1], hidden, (hidden, hidden))
    wv = _uniform_init(ks[2], hidden, (hidden, hidden))
    wo = _uniform_init(ks[3], hidden, (hidden, hidden))
    w1 = _uniform_init(ks[4], hidden, (hidden, ffh))
    b1 = _uniform_init(ks[5], hidden, (1, ffh))
    w2 = _uniform_init(ks[6], ffh, (ffh, hidden))
    b2 = _uniform_init(ks[7], ffh, (1, hidden))
    g1 = jnp.ones((1, hidden), jnp.float32)
    be1 = jnp.zeros((1, hidden), jnp.float32)
    g2 = jnp.ones((1, hidden), jnp.float32)
    be2 = jnp.zeros((1, hidden), jnp.float32)
    return {
        "wa": jnp.concatenate([wq, wk, wv, wo], axis=1),              # (H, 4H)
        "w1": w1,
        "w2": w2,
        "vec": jnp.concatenate([b1, b2, g1, be1, g2, be2], axis=0),   # (6, H)
    }


def init_params(key, node_dim=3, hidden=16, ffh=16, fes_embed_dim=16):
    k_emb, k_fes, k_dim, k_ind = jax.random.split(key, 4)
    return {
        "w_emb": _uniform_init(k_emb, node_dim, (node_dim, hidden)),
        "w_fes": _uniform_init(k_fes, 1, (1, fes_embed_dim)),
        "dim": init_encoder_params(k_dim, hidden, ffh),
        "ind": init_encoder_params(k_ind, hidden, ffh),
    }


# ----------------------------------------------------------------------------
# Pure-JAX reference (mirrors the module's _run) for a correctness cross-check
# ----------------------------------------------------------------------------
def reference_forward(xs, ys, fes, pp):
    bs, pop, dim = xs.shape
    H = pp["w_emb"].shape[1]
    exponent = jnp.floor(jnp.log(jnp.abs(ys)) / _LN10)
    mantissa = ys * jnp.exp(-exponent * _LN10)
    y_enc = mantissa / 10.0
    e_enc = (exponent + 1.0) / 32.0

    a_x = xs[:, :, :, None]
    a_y = jnp.broadcast_to(y_enc[:, :, None, None], (bs, pop, dim, 1))
    a_e = jnp.broadcast_to(e_enc[:, :, None, None], (bs, pop, dim, 1))
    raw = jnp.concatenate([a_x, a_y, a_e], axis=-1).transpose(0, 2, 1, 3)
    h = jnp.einsum("bdpc,ch->bdph", raw, pp["w_emb"]).reshape(bs * dim, pop, H)

    def enc(x3, prm):
        wa, w1, w2, vec = prm["wa"], prm["w1"], prm["w2"], prm["vec"]
        wq, wk, wv, wo = wa[:, :H], wa[:, H:2 * H], wa[:, 2 * H:3 * H], wa[:, 3 * H:]
        q, k, v = x3 @ wq, x3 @ wk, x3 @ wv
        s = jnp.einsum("bqh,bkh->bqk", q, k) / (H ** 0.5)
        attn = jax.nn.softmax(s, axis=-1)
        mha = jnp.einsum("bqk,bkh->bqh", attn, v) @ wo

        def ln(t, g, b):
            mu = t.mean(-1, keepdims=True)
            var = ((t - mu) ** 2).mean(-1, keepdims=True)
            return (t - mu) / jnp.sqrt(var + 1e-5) * g + b

        h1 = ln(x3 + mha, vec[2], vec[3])
        ff = jnp.maximum(h1 @ w1 + vec[0], 0.0) @ w2 + vec[1]
        return ln(h1 + ff, vec[4], vec[5])

    o_ij = enc(h, pp["dim"]).reshape(bs, dim, pop, H)
    o_i = o_ij.transpose(0, 2, 1, 3).reshape(bs * pop, dim, H)
    o_i = o_i + 0.5 * sinusoid_pe(dim, H)[None]
    o_i = enc(o_i, pp["ind"]).reshape(bs, pop, dim, H).mean(axis=2)

    embed_fes = fes @ pp["w_fes"]
    embed_fes = jnp.broadcast_to(embed_fes[:, None, :],
                                 (bs, pop, embed_fes.shape[-1]))
    return jnp.concatenate([o_i, embed_fes], axis=-1)


# ----------------------------------------------------------------------------
if __name__ == "__main__":
    key = jax.random.PRNGKey(0)
    k_x, k_y, k_f, k_p = jax.random.split(key, 4)

    bs, pop_size, dim = 2, 8, 4          # node_dim=3, hidden=16, ffh=16
    hidden, ffh = 16, 16

    x = jax.random.uniform(k_x, (bs, pop_size, dim), jnp.float32, -5.0, 5.0)
    y = jax.random.uniform(k_y, (bs, pop_size), jnp.float32, 0.5, 100.0)  # != 0
    fes = jax.random.uniform(k_f, (bs, 1), jnp.float32, 0.01, 1.0)

    params = init_params(k_p, node_dim=3, hidden=hidden, ffh=ffh)

    out = feature_extractor_forward(x, y, fes, params)
    jax.block_until_ready(out)
    assert out.shape == (bs, pop_size, hidden + 16), out.shape
    assert bool(jnp.all(jnp.isfinite(out)))

    ref = reference_forward(x, y, fes, params)
    err = float(jnp.max(jnp.abs(out - ref)))
    assert err < 2e-2, f"max abs error vs reference: {err}"

    print("KERNEL_OK")
</pallas_src>

<mosaic_0001>
module attributes {stable_mosaic.version = 11 : i64} {
  func.func @fused_feature_extractor_kernel(%arg0: i32, %arg1: memref<1x32x1xf32, #tpu.memory_space<vmem>>, %arg2: memref<1x32x1xf32, #tpu.memory_space<vmem>>, %arg3: memref<1x1x1xf32, #tpu.memory_space<vmem>>, %arg4: memref<32x16xf32, #tpu.memory_space<vmem>>, %arg5: memref<32x32xf32, #tpu.memory_space<vmem>>, %arg6: memref<32x32xf32, #tpu.memory_space<vmem>>, %arg7: memref<3x16xf32, #tpu.memory_space<vmem>>, %arg8: memref<1x16xf32, #tpu.memory_space<vmem>>, %arg9: memref<16x64xf32, #tpu.memory_space<vmem>>, %arg10: memref<16x16xf32, #tpu.memory_space<vmem>>, %arg11: memref<16x16xf32, #tpu.memory_space<vmem>>, %arg12: memref<6x16xf32, #tpu.memory_space<vmem>>, %arg13: memref<16x64xf32, #tpu.memory_space<vmem>>, %arg14: memref<16x16xf32, #tpu.memory_space<vmem>>, %arg15: memref<16x16xf32, #tpu.memory_space<vmem>>, %arg16: memref<6x16xf32, #tpu.memory_space<vmem>>, %arg17: memref<1x8x32xf32, #tpu.memory_space<vmem>>) attributes {dimension_semantics = [#tpu.dimension_semantics<parallel>], iteration_bounds = array<i64: 2>, scalar_prefetch = 0 : i64, scratch_operands = 0 : i64, tpu.core_type = #tpu.core_type<tc>, window_params = [{transform_indices = @transform_0, window_bounds = array<i64: 1, 32, 1>}, {transform_indices = @transform_1, window_bounds = array<i64: 1, 32, 1>}, {transform_indices = @transform_2, window_bounds = array<i64: 1, 1, 1>}, {pipeline_mode = #tpu.pipeline_mode<synchronous>, transform_indices = @transform_3, window_bounds = array<i64: 32, 16>}, {pipeline_mode = #tpu.pipeline_mode<synchronous>, transform_indices = @transform_4, window_bounds = array<i64: 32, 32>}, {pipeline_mode = #tpu.pipeline_mode<synchronous>, transform_indices = @transform_5, window_bounds = array<i64: 32, 32>}, {pipeline_mode = #tpu.pipeline_mode<synchronous>, transform_indices = @transform_6, window_bounds = array<i64: 3, 16>}, {pipeline_mode = #tpu.pipeline_mode<synchronous>, transform_indices = @transform_7, window_bounds = array<i64: 1, 16>}, {pipeline_mode = #tpu.pipeline_mode<synchronous>, transform_indices = @transform_8, window_bounds = array<i64: 16, 64>}, {pipeline_mode = #tpu.pipeline_mode<synchronous>, transform_indices = @transform_9, window_bounds = array<i64: 16, 16>}, {pipeline_mode = #tpu.pipeline_mode<synchronous>, transform_indices = @transform_10, window_bounds = array<i64: 16, 16>}, {pipeline_mode = #tpu.pipeline_mode<synchronous>, transform_indices = @transform_11, window_bounds = array<i64: 6, 16>}, {pipeline_mode = #tpu.pipeline_mode<synchronous>, transform_indices = @transform_12, window_bounds = array<i64: 16, 64>}, {pipeline_mode = #tpu.pipeline_mode<synchronous>, transform_indices = @transform_13, window_bounds = array<i64: 16, 16>}, {pipeline_mode = #tpu.pipeline_mode<synchronous>, transform_indices = @transform_14, window_bounds = array<i64: 16, 16>}, {pipeline_mode = #tpu.pipeline_mode<synchronous>, transform_indices = @transform_15, window_bounds = array<i64: 6, 16>}, {transform_indices = @transform_16, window_bounds = array<i64: 1, 8, 32>}]} {
    %c0 = arith.constant 0 : index
    %c0_0 = arith.constant 0 : index
    %c0_1 = arith.constant 0 : index
    %0 = vector.load %arg1[%c0, %c0_0, %c0_1] : memref<1x32x1xf32, #tpu.memory_space<vmem>>, vector<1x32x1xf32>
    %1 = vector.shape_cast %0 : vector<1x32x1xf32> to vector<32x1xf32>
    %c0_2 = arith.constant 0 : index
    %c0_3 = arith.constant 0 : index
    %c0_4 = arith.constant 0 : index
    %2 = vector.load %arg2[%c0_2, %c0_3, %c0_4] : memref<1x32x1xf32, #tpu.memory_space<vmem>>, vector<1x32x1xf32>
    %3 = vector.shape_cast %2 : vector<1x32x1xf32> to vector<32x1xf32>
    %4 = math.absf %3 : vector<32x1xf32>
    %5 = math.log %4 : vector<32x1xf32>
    %cst = arith.constant 0.434294492 : f32
    %6 = vector.broadcast %cst : f32 to vector<32x1xf32>
    %7 = arith.mulf %5, %6 : vector<32x1xf32>
    %8 = math.floor %7 : vector<32x1xf32>
    %cst_5 = arith.constant 0.000000e+00 : f32
    %9 = vector.broadcast %cst_5 : f32 to vector<32x1xf32>
    %10 = arith.subf %9, %8 : vector<32x1xf32>
    %cst_6 = arith.constant 2.30258512 : f32
    %11 = vector.broadcast %cst_6 : f32 to vector<32x1xf32>
    %12 = arith.mulf %10, %11 : vector<32x1xf32>
    %13 = math.exp %12 : vector<32x1xf32>
    %14 = arith.mulf %3, %13 : vector<32x1xf32>
    %cst_7 = arith.constant 1.000000e-01 : f32
    %15 = vector.broadcast %cst_7 : f32 to vector<32x1xf32>
    %16 = arith.mulf %14, %15 : vector<32x1xf32>
    %cst_8 = arith.constant 1.000000e+00 : f32
    %17 = vector.broadcast %cst_8 : f32 to vector<32x1xf32>
    %18 = arith.addf %8, %17 : vector<32x1xf32>
    %cst_9 = arith.constant 3.125000e-02 : f32
    %19 = vector.broadcast %cst_9 : f32 to vector<32x1xf32>
    %20 = arith.mulf %18, %19 : vector<32x1xf32>
    %c0_10 = arith.constant 0 : index
    %c0_11 = arith.constant 0 : index
    %21 = vector.load %arg7[%c0_10, %c0_11] : memref<3x16xf32, #tpu.memory_space<vmem>>, vector<3x16xf32>
    %22 = vector.extract_strided_slice %21 {offsets = [0, 0], sizes = [1, 16], strides = [1, 1]} : vector<3x16xf32> to vector<1x16xf32>
    %23 = vector.broadcast %1 : vector<32x1xf32> to vector<32x16xf32>
    %24 = vector.broadcast %22 : vector<1x16xf32> to vector<32x16xf32>
    %25 = arith.mulf %23, %24 : vector<32x16xf32>
    %26 = vector.extract_strided_slice %21 {offsets = [1, 0], sizes = [1, 16], strides = [1, 1]} : vector<3x16xf32> to vector<1x16xf32>
    %27 = vector.broadcast %16 : vector<32x1xf32> to vector<32x16xf32>
    %28 = vector.broadcast %26 : vector<1x16xf32> to vector<32x16xf32>
    %29 = arith.mulf %27, %28 : vector<32x16xf32>
    %30 = arith.addf %25, %29 : vector<32x16xf32>
    %31 = vector.extract_strided_slice %21 {offsets = [2, 0], sizes = [1, 16], strides = [1, 1]} : vector<3x16xf32> to vector<1x16xf32>
    %32 = vector.broadcast %20 : vector<32x1xf32> to vector<32x16xf32>
    %33 = vector.broadcast %31 : vector<1x16xf32> to vector<32x16xf32>
    %34 = arith.mulf %32, %33 : vector<32x16xf32>
    %35 = arith.addf %30, %34 : vector<32x16xf32>
    %c0_12 = arith.constant 0 : index
    %c0_13 = arith.constant 0 : index
    %36 = vector.load %arg5[%c0_12, %c0_13] : memref<32x32xf32, #tpu.memory_space<vmem>>, vector<32x32xf32>
    %c0_14 = arith.constant 0 : index
    %c0_15 = arith.constant 0 : index
    %37 = vector.load %arg9[%c0_14, %c0_15] : memref<16x64xf32, #tpu.memory_space<vmem>>, vector<16x64xf32>
    %c0_16 = arith.constant 0 : index
    %c0_17 = arith.constant 0 : index
    %38 = vector.load %arg12[%c0_16, %c0_17] : memref<6x16xf32, #tpu.memory_space<vmem>>, vector<6x16xf32>
    %39 = vector.extract_strided_slice %37 {offsets = [0, 0], sizes = [16, 48], strides = [1, 1]} : vector<16x64xf32> to vector<16x48xf32>
    %cst_18 = arith.constant dense<0.000000e+00> : vector<32x48xf32>
    %40 = tpu.matmul %35, %39, %cst_18 {dimension_numbers = #tpu.dot_dimension_numbers<[1], [0], [0], [1], [0, 0, 1, 1], [], []>} : vector<32x16xf32>, vector<16x48xf32>, vector<32x48xf32> -> vector<32x48xf32>
    %41 = vector.extract_strided_slice %40 {offsets = [0, 0], sizes = [32, 16], strides = [1, 1]} : vector<32x48xf32> to vector<32x16xf32>
    %42 = vector.extract_strided_slice %40 {offsets = [0, 16], sizes = [32, 16], strides = [1, 1]} : vector<32x48xf32> to vector<32x16xf32>
    %43 = vector.extract_strided_slice %40 {offsets = [0, 32], sizes = [32, 16], strides = [1, 1]} : vector<32x48xf32> to vector<32x16xf32>
    %cst_19 = arith.constant dense<0.000000e+00> : vector<32x32xf32>
    %44 = tpu.matmul %41, %42, %cst_19 {dimension_numbers = #tpu.dot_dimension_numbers<[1], [1], [0], [0], [0, 0, 1, 0], [], []>} : vector<32x16xf32>, vector<32x16xf32>, vector<32x32xf32> -> vector<32x32xf32>
    %cst_20 = arith.constant 2.500000e-01 : f32
    %45 = vector.broadcast %cst_20 : f32 to vector<32x32xf32>
    %46 = arith.mulf %44, %45 : vector<32x32xf32>
    %47 = arith.addf %46, %36 : vector<32x32xf32>
    %cst_21 = arith.constant dense<0xFF800000> : vector<32xf32>
    %48 = vector.multi_reduction <maximumf>, %47, %cst_21 [1] : vector<32x32xf32> to vector<32xf32>
    %49 = vector.shape_cast %48 : vector<32xf32> to vector<32x1xf32>
    %50 = vector.broadcast %49 : vector<32x1xf32> to vector<32x32xf32>
    %51 = arith.subf %47, %50 : vector<32x32xf32>
    %52 = math.exp %51 : vector<32x32xf32>
    %cst_22 = arith.constant dense<0.000000e+00> : vector<32xf32>
    %53 = vector.multi_reduction <add>, %52, %cst_22 [1] : vector<32x32xf32> to vector<32xf32>
    %54 = vector.shape_cast %53 : vector<32xf32> to vector<32x1xf32>
    %55 = tpu.reciprocal %54 {approx = true} : vector<32x1xf32> -> vector<32x1xf32>
    %56 = vector.broadcast %55 : vector<32x1xf32> to vector<32x32xf32>
    %57 = arith.mulf %52, %56 : vector<32x32xf32>
    %cst_23 = arith.constant dense<0.000000e+00> : vector<32x16xf32>
    %58 = tpu.matmul %57, %43, %cst_23 {dimension_numbers = #tpu.dot_dimension_numbers<[1], [0], [0], [1], [0, 0, 1, 1], [], []>} : vector<32x32xf32>, vector<32x16xf32>, vector<32x16xf32> -> vector<32x16xf32>
    %59 = vector.extract_strided_slice %37 {offsets = [0, 48], sizes = [16, 16], strides = [1, 1]} : vector<16x64xf32> to vector<16x16xf32>
    %cst_24 = arith.constant dense<0.000000e+00> : vector<32x16xf32>
    %60 = tpu.matmul %58, %59, %cst_24 {dimension_numbers = #tpu.dot_dimension_numbers<[1], [0], [0], [1], [0, 0, 1, 1], [], []>} : vector<32x16xf32>, vector<16x16xf32>, vector<32x16xf32> -> vector<32x16xf32>
    %61 = arith.addf %35, %60 : vector<32x16xf32>
    %62 = vector.extract_strided_slice %38 {offsets = [2, 0], sizes = [1, 16], strides = [1, 1]} : vector<6x16xf32> to vector<1x16xf32>
    %63 = vector.extract_strided_slice %38 {offsets = [3, 0], sizes = [1, 16], strides = [1, 1]} : vector<6x16xf32> to vector<1x16xf32>
    %cst_25 = arith.constant dense<0.000000e+00> : vector<32xf32>
    %64 = vector.multi_reduction <add>, %61, %cst_25 [1] : vector<32x16xf32> to vector<32xf32>
    %65 = vector.shape_cast %64 : vector<32xf32> to vector<32x1xf32>
    %cst_26 = arith.constant 1.600000e+01 : f32
    %66 = vector.broadcast %cst_26 : f32 to vector<32x1xf32>
    %67 = arith.divf %65, %66 : vector<32x1xf32>
    %68 = vector.broadcast %67 : vector<32x1xf32> to vector<32x16xf32>
    %69 = arith.subf %61, %68 : vector<32x16xf32>
    %70 = arith.mulf %69, %69 : vector<32x16xf32>
    %cst_27 = arith.constant dense<0.000000e+00> : vector<32xf32>
    %71 = vector.multi_reduction <add>, %70, %cst_27 [1] : vector<32x16xf32> to vector<32xf32>
    %72 = vector.shape_cast %71 : vector<32xf32> to vector<32x1xf32>
    %cst_28 = arith.constant 1.600000e+01 : f32
    %73 = vector.broadcast %cst_28 : f32 to vector<32x1xf32>
    %74 = arith.divf %72, %73 : vector<32x1xf32>
    %75 = vector.broadcast %67 : vector<32x1xf32> to vector<32x16xf32>
    %76 = arith.subf %61, %75 : vector<32x16xf32>
    %cst_29 = arith.constant 9.99999974E-6 : f32
    %77 = vector.broadcast %cst_29 : f32 to vector<32x1xf32>
    %78 = arith.addf %74, %77 : vector<32x1xf32>
    %79 = math.rsqrt %78 : vector<32x1xf32>
    %80 = vector.broadcast %79 : vector<32x1xf32> to vector<32x16xf32>
    %81 = arith.mulf %76, %80 : vector<32x16xf32>
    %82 = vector.broadcast %62 : vector<1x16xf32> to vector<32x16xf32>
    %83 = arith.mulf %81, %82 : vector<32x16xf32>
    %84 = vector.broadcast %63 : vector<1x16xf32> to vector<32x16xf32>
    %85 = arith.addf %83, %84 : vector<32x16xf32>
    %c0_30 = arith.constant 0 : index
    %c0_31 = arith.constant 0 : index
    %86 = vector.load %arg10[%c0_30, %c0_31] : memref<16x16xf32, #tpu.memory_space<vmem>>, vector<16x16xf32>
    %cst_32 = arith.constant dense<0.000000e+00> : vector<32x16xf32>
    %87 = tpu.matmul %85, %86, %cst_32 {dimension_numbers = #tpu.dot_dimension_numbers<[1], [0], [0], [1], [0, 0, 1, 1], [], []>} : vector<32x16xf32>, vector<16x16xf32>, vector<32x16xf32> -> vector<32x16xf32>
    %88 = vector.extract_strided_slice %38 {offsets = [0, 0], sizes = [1, 16], strides = [1, 1]} : vector<6x16xf32> to vector<1x16xf32>
    %89 = vector.broadcast %88 : vector<1x16xf32> to vector<32x16xf32>
    %90 = arith.addf %87, %89 : vector<32x16xf32>
    %cst_33 = arith.constant 0.000000e+00 : f32
    %91 = vector.broadcast %cst_33 : f32 to vector<32x16xf32>
    %92 = arith.maximumf %90, %91 : vector<32x16xf32>
    %c0_34 = arith.constant 0 : index
    %c0_35 = arith.constant 0 : index
    %93 = vector.load %arg11[%c0_34, %c0_35] : memref<16x16xf32, #tpu.memory_space<vmem>>, vector<16x16xf32>
    %cst_36 = arith.constant dense<0.000000e+00> : vector<32x16xf32>
    %94 = tpu.matmul %92, %93, %cst_36 {dimension_numbers = #tpu.dot_dimension_numbers<[1], [0], [0], [1], [0, 0, 1, 1], [], []>} : vector<32x16xf32>, vector<16x16xf32>, vector<32x16xf32> -> vector<32x16xf32>
    %95 = vector.extract_strided_slice %38 {offsets = [1, 0], sizes = [1, 16], strides = [1, 1]} : vector<6x16xf32> to vector<1x16xf32>
    %96 = vector.broadcast %95 : vector<1x16xf32> to vector<32x16xf32>
    %97 = arith.addf %94, %96 : vector<32x16xf32>
    %98 = arith.addf %85, %97 : vector<32x16xf32>
    %99 = vector.extract_strided_slice %38 {offsets = [4, 0], sizes = [1, 16], strides = [1, 1]} : vector<6x16xf32> to vector<1x16xf32>
    %100 = vector.extract_strided_slice %38 {offsets = [5, 0], sizes = [1, 16], strides = [1, 1]} : vector<6x16xf32> to vector<1x16xf32>
    %cst_37 = arith.constant dense<0.000000e+00> : vector<32xf32>
    %101 = vector.multi_reduction <add>, %98, %cst_37 [1] : vector<32x16xf32> to vector<32xf32>
    %102 = vector.shape_cast %101 : vector<32xf32> to vector<32x1xf32>
    %cst_38 = arith.constant 1.600000e+01 : f32
    %103 = vector.broadcast %cst_38 : f32 to vector<32x1xf32>
    %104 = arith.divf %102, %103 : vector<32x1xf32>
    %105 = vector.broadcast %104 : vector<32x1xf32> to vector<32x16xf32>
    %106 = arith.subf %98, %105 : vector<32x16xf32>
    %107 = arith.mulf %106, %106 : vector<32x16xf32>
    %cst_39 = arith.constant dense<0.000000e+00> : vector<32xf32>
    %108 = vector.multi_reduction <add>, %107, %cst_39 [1] : vector<32x16xf32> to vector<32xf32>
    %109 = vector.shape_cast %108 : vector<32xf32> to vector<32x1xf32>
    %cst_40 = arith.constant 1.600000e+01 : f32
    %110 = vector.broadcast %cst_40 : f32 to vector<32x1xf32>
    %111 = arith.divf %109, %110 : vector<32x1xf32>
    %112 = vector.broadcast %104 : vector<32x1xf32> to vector<32x16xf32>
    %113 = arith.subf %98, %112 : vector<32x16xf32>
    %cst_41 = arith.constant 9.99999974E-6 : f32
    %114 = vector.broadcast %cst_41 : f32 to vector<32x1xf32>
    %115 = arith.addf %111, %114 : vector<32x1xf32>
    %116 = math.rsqrt %115 : vector<32x1xf32>
    %117 = vector.broadcast %116 : vector<32x1xf32> to vector<32x16xf32>
    %118 = arith.mulf %113, %117 : vector<32x16xf32>
    %119 = vector.broadcast %99 : vector<1x16xf32> to vector<32x16xf32>
    %120 = arith.mulf %118, %119 : vector<32x16xf32>
    %121 = vector.broadcast %100 : vector<1x16xf32> to vector<32x16xf32>
    %122 = arith.addf %120, %121 : vector<32x16xf32>
    %c0_42 = arith.constant 0 : index
    %c0_43 = arith.constant 0 : index
    %123 = vector.load %arg4[%c0_42, %c0_43] : memref<32x16xf32, #tpu.memory_space<vmem>>, vector<32x16xf32>
    %124 = arith.addf %122, %123 : vector<32x16xf32>
    %c0_44 = arith.constant 0 : index
    %c0_45 = arith.constant 0 : index
    %125 = vector.load %arg6[%c0_44, %c0_45] : memref<32x32xf32, #tpu.memory_space<vmem>>, vector<32x32xf32>
    %c0_46 = arith.constant 0 : index
    %c0_47 = arith.constant 0 : index
    %126 = vector.load %arg13[%c0_46, %c0_47] : memref<16x64xf32, #tpu.memory_space<vmem>>, vector<16x64xf32>
    %c0_48 = arith.constant 0 : index
    %c0_49 = arith.constant 0 : index
    %127 = vector.load %arg16[%c0_48, %c0_49] : memref<6x16xf32, #tpu.memory_space<vmem>>, vector<6x16xf32>
    %128 = vector.extract_strided_slice %126 {offsets = [0, 0], sizes = [16, 48], strides = [1, 1]} : vector<16x64xf32> to vector<16x48xf32>
    %cst_50 = arith.constant dense<0.000000e+00> : vector<32x48xf32>
    %129 = tpu.matmul %124, %128, %cst_50 {dimension_numbers = #tpu.dot_dimension_numbers<[1], [0], [0], [1], [0, 0, 1, 1], [], []>} : vector<32x16xf32>, vector<16x48xf32>, vector<32x48xf32> -> vector<32x48xf32>
    %130 = vector.extract_strided_slice %129 {offsets = [0, 0], sizes = [32, 16], strides = [1, 1]} : vector<32x48xf32> to vector<32x16xf32>
    %131 = vector.extract_strided_slice %129 {offsets = [0, 16], sizes = [32, 16], strides = [1, 1]} : vector<32x48xf32> to vector<32x16xf32>
    %132 = vector.extract_strided_slice %129 {offsets = [0, 32], sizes = [32, 16], strides = [1, 1]} : vector<32x48xf32> to vector<32x16xf32>
    %cst_51 = arith.constant dense<0.000000e+00> : vector<32x32xf32>
    %133 = tpu.matmul %130, %131, %cst_51 {dimension_numbers = #tpu.dot_dimension_numbers<[1], [1], [0], [0], [0, 0, 1, 0], [], []>} : vector<32x16xf32>, vector<32x16xf32>, vector<32x32xf32> -> vector<32x32xf32>
    %cst_52 = arith.constant 2.500000e-01 : f32
    %134 = vector.broadcast %cst_52 : f32 to vector<32x32xf32>
    %135 = arith.mulf %133, %134 : vector<32x32xf32>
    %136 = arith.addf %135, %125 : vector<32x32xf32>
    %cst_53 = arith.constant dense<0xFF800000> : vector<32xf32>
    %137 = vector.multi_reduction <maximumf>, %136, %cst_53 [1] : vector<32x32xf32> to vector<32xf32>
    %138 = vector.shape_cast %137 : vector<32xf32> to vector<32x1xf32>
    %139 = vector.broadcast %138 : vector<32x1xf32> to vector<32x32xf32>
    %140 = arith.subf %136, %139 : vector<32x32xf32>
    %141 = math.exp %140 : vector<32x32xf32>
    %cst_54 = arith.constant dense<0.000000e+00> : vector<32xf32>
    %142 = vector.multi_reduction <add>, %141, %cst_54 [1] : vector<32x32xf32> to vector<32xf32>
    %143 = vector.shape_cast %142 : vector<32xf32> to vector<32x1xf32>
    %144 = tpu.reciprocal %143 {approx = true} : vector<32x1xf32> -> vector<32x1xf32>
    %145 = vector.broadcast %144 : vector<32x1xf32> to vector<32x32xf32>
    %146 = arith.mulf %141, %145 : vector<32x32xf32>
    %cst_55 = arith.constant dense<0.000000e+00> : vector<32x16xf32>
    %147 = tpu.matmul %146, %132, %cst_55 {dimension_numbers = #tpu.dot_dimension_numbers<[1], [0], [0], [1], [0, 0, 1, 1], [], []>} : vector<32x32xf32>, vector<32x16xf32>, vector<32x16xf32> -> vector<32x16xf32>
    %148 = vector.extract_strided_slice %126 {offsets = [0, 48], sizes = [16, 16], strides = [1, 1]} : vector<16x64xf32> to vector<16x16xf32>
    %cst_56 = arith.constant dense<0.000000e+00> : vector<32x16xf32>
    %149 = tpu.matmul %147, %148, %cst_56 {dimension_numbers = #tpu.dot_dimension_numbers<[1], [0], [0], [1], [0, 0, 1, 1], [], []>} : vector<32x16xf32>, vector<16x16xf32>, vector<32x16xf32> -> vector<32x16xf32>
    %150 = arith.addf %124, %149 : vector<32x16xf32>
    %151 = vector.extract_strided_slice %127 {offsets = [2, 0], sizes = [1, 16], strides = [1, 1]} : vector<6x16xf32> to vector<1x16xf32>
    %152 = vector.extract_strided_slice %127 {offsets = [3, 0], sizes = [1, 16], strides = [1, 1]} : vector<6x16xf32> to vector<1x16xf32>
    %cst_57 = arith.constant dense<0.000000e+00> : vector<32xf32>
    %153 = vector.multi_reduction <add>, %150, %cst_57 [1] : vector<32x16xf32> to vector<32xf32>
    %154 = vector.shape_cast %153 : vector<32xf32> to vector<32x1xf32>
    %cst_58 = arith.constant 1.600000e+01 : f32
    %155 = vector.broadcast %cst_58 : f32 to vector<32x1xf32>
    %156 = arith.divf %154, %155 : vector<32x1xf32>
    %157 = vector.broadcast %156 : vector<32x1xf32> to vector<32x16xf32>
    %158 = arith.subf %150, %157 : vector<32x16xf32>
    %159 = arith.mulf %158, %158 : vector<32x16xf32>
    %cst_59 = arith.constant dense<0.000000e+00> : vector<32xf32>
    %160 = vector.multi_reduction <add>, %159, %cst_59 [1] : vector<32x16xf32> to vector<32xf32>
    %161 = vector.shape_cast %160 : vector<32xf32> to vector<32x1xf32>
    %cst_60 = arith.constant 1.600000e+01 : f32
    %162 = vector.broadcast %cst_60 : f32 to vector<32x1xf32>
    %163 = arith.divf %161, %162 : vector<32x1xf32>
    %164 = vector.broadcast %156 : vector<32x1xf32> to vector<32x16xf32>
    %165 = arith.subf %150, %164 : vector<32x16xf32>
    %cst_61 = arith.constant 9.99999974E-6 : f32
    %166 = vector.broadcast %cst_61 : f32 to vector<32x1xf32>
    %167 = arith.addf %163, %166 : vector<32x1xf32>
    %168 = math.rsqrt %167 : vector<32x1xf32>
    %169 = vector.broadcast %168 : vector<32x1xf32> to vector<32x16xf32>
    %170 = arith.mulf %165, %169 : vector<32x16xf32>
    %171 = vector.broadcast %151 : vector<1x16xf32> to vector<32x16xf32>
    %172 = arith.mulf %170, %171 : vector<32x16xf32>
    %173 = vector.broadcast %152 : vector<1x16xf32> to vector<32x16xf32>
    %174 = arith.addf %172, %173 : vector<32x16xf32>
    %c0_62 = arith.constant 0 : index
    %c0_63 = arith.constant 0 : index
    %175 = vector.load %arg14[%c0_62, %c0_63] : memref<16x16xf32, #tpu.memory_space<vmem>>, vector<16x16xf32>
    %cst_64 = arith.constant dense<0.000000e+00> : vector<32x16xf32>
    %176 = tpu.matmul %174, %175, %cst_64 {dimension_numbers = #tpu.dot_dimension_numbers<[1], [0], [0], [1], [0, 0, 1, 1], [], []>} : vector<32x16xf32>, vector<16x16xf32>, vector<32x16xf32> -> vector<32x16xf32>
    %177 = vector.extract_strided_slice %127 {offsets = [0, 0], sizes = [1, 16], strides = [1, 1]} : vector<6x16xf32> to vector<1x16xf32>
    %178 = vector.broadcast %177 : vector<1x16xf32> to vector<32x16xf32>
    %179 = arith.addf %176, %178 : vector<32x16xf32>
    %cst_65 = arith.constant 0.000000e+00 : f32
    %180 = vector.broadcast %cst_65 : f32 to vector<32x16xf32>
    %181 = arith.maximumf %179, %180 : vector<32x16xf32>
    %c0_66 = arith.constant 0 : index
    %c0_67 = arith.constant 0 : index
    %182 = vector.load %arg15[%c0_66, %c0_67] : memref<16x16xf32, #tpu.memory_space<vmem>>, vector<16x16xf32>
    %cst_68 = arith.constant dense<0.000000e+00> : vector<32x16xf32>
    %183 = tpu.matmul %181, %182, %cst_68 {dimension_numbers = #tpu.dot_dimension_numbers<[1], [0], [0], [1], [0, 0, 1, 1], [], []>} : vector<32x16xf32>, vector<16x16xf32>, vector<32x16xf32> -> vector<32x16xf32>
    %184 = vector.extract_strided_slice %127 {offsets = [1, 0], sizes = [1, 16], strides = [1, 1]} : vector<6x16xf32> to vector<1x16xf32>
    %185 = vector.broadcast %184 : vector<1x16xf32> to vector<32x16xf32>
    %186 = arith.addf %183, %185 : vector<32x16xf32>
    %187 = arith.addf %174, %186 : vector<32x16xf32>
    %188 = vector.extract_strided_slice %127 {offsets = [4, 0], sizes = [1, 16], strides = [1, 1]} : vector<6x16xf32> to vector<1x16xf32>
    %189 = vector.extract_strided_slice %127 {offsets = [5, 0], sizes = [1, 16], strides = [1, 1]} : vector<6x16xf32> to vector<1x16xf32>
    %cst_69 = arith.constant dense<0.000000e+00> : vector<32xf32>
    %190 = vector.multi_reduction <add>, %187, %cst_69 [1] : vector<32x16xf32> to vector<32xf32>
    %191 = vector.shape_cast %190 : vector<32xf32> to vector<32x1xf32>
    %cst_70 = arith.constant 1.600000e+01 : f32
    %192 = vector.broadcast %cst_70 : f32 to vector<32x1xf32>
    %193 = arith.divf %191, %192 : vector<32x1xf32>
    %194 = vector.broadcast %193 : vector<32x1xf32> to vector<32x16xf32>
    %195 = arith.subf %187, %194 : vector<32x16xf32>
    %196 = arith.mulf %195, %195 : vector<32x16xf32>
    %cst_71 = arith.constant dense<0.000000e+00> : vector<32xf32>
    %197 = vector.multi_reduction <add>, %196, %cst_71 [1] : vector<32x16xf32> to vector<32xf32>
    %198 = vector.shape_cast %197 : vector<32xf32> to vector<32x1xf32>
    %cst_72 = arith.constant 1.600000e+01 : f32
    %199 = vector.broadcast %cst_72 : f32 to vector<32x1xf32>
    %200 = arith.divf %198, %199 : vector<32x1xf32>
    %201 = vector.broadcast %193 : vector<32x1xf32> to vector<32x16xf32>
    %202 = arith.subf %187, %201 : vector<32x16xf32>
    %cst_73 = arith.constant 9.99999974E-6 : f32
    %203 = vector.broadcast %cst_73 : f32 to vector<32x1xf32>
    %204 = arith.addf %200, %203 : vector<32x1xf32>
    %205 = math.rsqrt %204 : vector<32x1xf32>
    %206 = vector.broadcast %205 : vector<32x1xf32> to vector<32x16xf32>
    %207 = arith.mulf %202, %206 : vector<32x16xf32>
    %208 = vector.broadcast %188 : vector<1x16xf32> to vector<32x16xf32>
    %209 = arith.mulf %207, %208 : vector<32x16xf32>
    %210 = vector.broadcast %189 : vector<1x16xf32> to vector<32x16xf32>
    %211 = arith.addf %209, %210 : vector<32x16xf32>
    %212 = vector.extract_strided_slice %211 {offsets = [0, 0], sizes = [8, 16], strides = [1, 1]} : vector<32x16xf32> to vector<8x16xf32>
    %213 = vector.extract_strided_slice %211 {offsets = [8, 0], sizes = [8, 16], strides = [1, 1]} : vector<32x16xf32> to vector<8x16xf32>
    %214 = arith.addf %212, %213 : vector<8x16xf32>
    %215 = vector.extract_strided_slice %211 {offsets = [16, 0], sizes = [8, 16], strides = [1, 1]} : vector<32x16xf32> to vector<8x16xf32>
    %216 = arith.addf %214, %215 : vector<8x16xf32>
    %217 = vector.extract_strided_slice %211 {offsets = [24, 0], sizes = [8, 16], strides = [1, 1]} : vector<32x16xf32> to vector<8x16xf32>
    %218 = arith.addf %216, %217 : vector<8x16xf32>
    %cst_74 = arith.constant 2.500000e-01 : f32
    %219 = vector.broadcast %cst_74 : f32 to vector<8x16xf32>
    %220 = arith.mulf %218, %219 : vector<8x16xf32>
    %c0_75 = arith.constant 0 : index
    %c0_76 = arith.constant 0 : index
    %c0_77 = arith.constant 0 : index
    %221 = vector.load %arg3[%c0_75, %c0_76, %c0_77] : memref<1x1x1xf32, #tpu.memory_space<vmem>>, vector<1x1x1xf32>
    %222 = vector.shape_cast %221 : vector<1x1x1xf32> to vector<1x1xf32>
    %c0_78 = arith.constant 0 : index
    %c0_79 = arith.constant 0 : index
    %223 = vector.load %arg8[%c0_78, %c0_79] : memref<1x16xf32, #tpu.memory_space<vmem>>, vector<1x16xf32>
    %224 = vector.broadcast %222 : vector<1x1xf32> to vector<1x16xf32>
    %225 = arith.mulf %224, %223 : vector<1x16xf32>
    %226 = vector.shape_cast %225 : vector<1x16xf32> to vector<1x16xf32>
    %227 = vector.broadcast %226 : vector<1x16xf32> to vector<8x16xf32>
    %228 = tpu.concatenate %220, %227 in 1 : vector<8x16xf32>, vector<8x16xf32> -> vector<8x32xf32>
    %c0_80 = arith.constant 0 : index
    %c0_81 = arith.constant 0 : index
    %c0_82 = arith.constant 0 : index
    %229 = vector.load %arg17[%c0_80, %c0_81, %c0_82] : memref<1x8x32xf32, #tpu.memory_space<vmem>>, vector<1x8x32xf32>
    %230 = vector.shape_cast %229 : vector<1x8x32xf32> to vector<8x32xf32>
    %231 = vector.shape_cast %228 : vector<8x32xf32> to vector<1x8x32xf32>
    tpu.vector_store %arg17[%c0_80, %c0_81, %c0_82], %231 {strides = array<i32>} : memref<1x8x32xf32, #tpu.memory_space<vmem>>, vector<1x8x32xf32>,
    return
  }
  func.func @transform_0(%arg0: i32) -> (i32, i32, i32) {
    %c0_i32 = arith.constant 0 : i32
    %c0_i32_0 = arith.constant 0 : i32
    %c0_i32_1 = arith.constant 0 : i32
    return %arg0, %c0_i32, %c0_i32_0 : i32, i32, i32
  }
  func.func @transform_1(%arg0: i32) -> (i32, i32, i32) {
    %c0_i32 = arith.constant 0 : i32
    %c0_i32_0 = arith.constant 0 : i32
    %c0_i32_1 = arith.constant 0 : i32
    return %arg0, %c0_i32, %c0_i32_0 : i32, i32, i32
  }
  func.func @transform_2(%arg0: i32) -> (i32, i32, i32) {
    %c0_i32 = arith.constant 0 : i32
    %c0_i32_0 = arith.constant 0 : i32
    %c0_i32_1 = arith.constant 0 : i32
    return %arg0, %c0_i32, %c0_i32_0 : i32, i32, i32
  }
  func.func @transform_3(%arg0: i32) -> (i32, i32) {
    %c0_i32 = arith.constant 0 : i32
    %c0_i32_0 = arith.constant 0 : i32
    %c0_i32_1 = arith.constant 0 : i32
    return %c0_i32, %c0_i32_0 : i32, i32
  }
  func.func @transform_4(%arg0: i32) -> (i32, i32) {
    %c0_i32 = arith.constant 0 : i32
    %c0_i32_0 = arith.constant 0 : i32
    %c0_i32_1 = arith.constant 0 : i32
    return %c0_i32, %c0_i32_0 : i32, i32
  }
  func.func @transform_5(%arg0: i32) -> (i32, i32) {
    %c0_i32 = arith.constant 0 : i32
    %c0_i32_0 = arith.constant 0 : i32
    %c0_i32_1 = arith.constant 0 : i32
    return %c0_i32, %c0_i32_0 : i32, i32
  }
  func.func @transform_6(%arg0: i32) -> (i32, i32) {
    %c0_i32 = arith.constant 0 : i32
    %c0_i32_0 = arith.constant 0 : i32
    %c0_i32_1 = arith.constant 0 : i32
    return %c0_i32, %c0_i32_0 : i32, i32
  }
  func.func @transform_7(%arg0: i32) -> (i32, i32) {
    %c0_i32 = arith.constant 0 : i32
    %c0_i32_0 = arith.constant 0 : i32
    %c0_i32_1 = arith.constant 0 : i32
    return %c0_i32, %c0_i32_0 : i32, i32
  }
  func.func @transform_8(%arg0: i32) -> (i32, i32) {
    %c0_i32 = arith.constant 0 : i32
    %c0_i32_0 = arith.constant 0 : i32
    %c0_i32_1 = arith.constant 0 : i32
    return %c0_i32, %c0_i32_0 : i32, i32
  }
  func.func @transform_9(%arg0: i32) -> (i32, i32) {
    %c0_i32 = arith.constant 0 : i32
    %c0_i32_0 = arith.constant 0 : i32
    %c0_i32_1 = arith.constant 0 : i32
    return %c0_i32, %c0_i32_0 : i32, i32
  }
  func.func @transform_10(%arg0: i32) -> (i32, i32) {
    %c0_i32 = arith.constant 0 : i32
    %c0_i32_0 = arith.constant 0 : i32
    %c0_i32_1 = arith.constant 0 : i32
    return %c0_i32, %c0_i32_0 : i32, i32
  }
  func.func @transform_11(%arg0: i32) -> (i32, i32) {
    %c0_i32 = arith.constant 0 : i32
    %c0_i32_0 = arith.constant 0 : i32
    %c0_i32_1 = arith.constant 0 : i32
    return %c0_i32, %c0_i32_0 : i32, i32
  }
  func.func @transform_12(%arg0: i32) -> (i32, i32) {
    %c0_i32 = arith.constant 0 : i32
    %c0_i32_0 = arith.constant 0 : i32
    %c0_i32_1 = arith.constant 0 : i32
    return %c0_i32, %c0_i32_0 : i32, i32
  }
  func.func @transform_13(%arg0: i32) -> (i32, i32) {
    %c0_i32 = arith.constant 0 : i32
    %c0_i32_0 = arith.constant 0 : i32
    %c0_i32_1 = arith.constant 0 : i32
    return %c0_i32, %c0_i32_0 : i32, i32
  }
  func.func @transform_14(%arg0: i32) -> (i32, i32) {
    %c0_i32 = arith.constant 0 : i32
    %c0_i32_0 = arith.constant 0 : i32
    %c0_i32_1 = arith.constant 0 : i32
    return %c0_i32, %c0_i32_0 : i32, i32
  }
  func.func @transform_15(%arg0: i32) -> (i32, i32) {
    %c0_i32 = arith.constant 0 : i32
    %c0_i32_0 = arith.constant 0 : i32
    %c0_i32_1 = arith.constant 0 : i32
    return %c0_i32, %c0_i32_0 : i32, i32
  }
  func.func @transform_16(%arg0: i32) -> (i32, i32, i32) {
    %c0_i32 = arith.constant 0 : i32
    %c0_i32_0 = arith.constant 0 : i32
    %c0_i32_1 = arith.constant 0 : i32
    return %arg0, %c0_i32, %c0_i32_0 : i32, i32, i32
  }
}

</mosaic_0001>

<bundles_post_ra>
// kernel: feature_extractor_forward.1
= control target key start
LH: loop header
LB: loop body
LE: loop exit
PB: predicated region body
PF: predicated region fallthrough
CT: control target
= control target key end

     0   :  { %s2809_s0 = inlined_call_operand.vmem [shape: f32[2,32,1], index: 0, kind: input, shape index: {}]   ;;  %s2810_s1 = inlined_call_operand.vmem [shape: f32[2,32,1], index: 1, kind: input, shape index: {}]   ;;  %s2811_s2 = inlined_call_operand.vmem [shape: f32[2,1,1], index: 2, kind: input, shape index: {}]   ;;  %s2812_s3 = inlined_call_operand.vmem [shape: f32[32,16], index: 3, kind: input, shape index: {}]   ;;  %s2813_s4 = inlined_call_operand.vmem [shape: f32[32,32], index: 4, kind: input, shape index: {}]   ;;  %s2814_s5 = inlined_call_operand.vmem [shape: f32[32,32], index: 5, kind: input, shape index: {}]   ;;  %s2815_s6 = inlined_call_operand.vmem [shape: f32[3,16], index: 6, kind: input, shape index: {}]   ;;  %s2816_s7 = inlined_call_operand.vmem [shape: f32[1,16], index: 7, kind: input, shape index: {}]   ;;  %s2817_s8 = inlined_call_operand.vmem [shape: f32[16,64], index: 8, kind: input, shape index: {}]   ;;  %s2818_s9 = inlined_call_operand.vmem [shape: f32[16,16], index: 9, kind: input, shape index: {}]   ;;  %s2819_s10 = inlined_call_operand.vmem [shape: f32[16,16], index: 10, kind: input, shape index: {}]   ;;  %s2820_s11 = inlined_call_operand.vmem [shape: f32[6,16], index: 11, kind: input, shape index: {}]   ;;  %s2821_s12 = inlined_call_operand.vmem [shape: f32[16,64], index: 12, kind: input, shape index: {}]   ;;  %s2822_s13 = inlined_call_operand.vmem [shape: f32[16,16], index: 13, kind: input, shape index: {}]   ;;  %s2823_s14 = inlined_call_operand.vmem [shape: f32[16,16], index: 14, kind: input, shape index: {}]   ;;  %s2824_s15 = inlined_call_operand.vmem [shape: f32[6,16], index: 15, kind: input, shape index: {}]   ;;  %s2825_s16 = inlined_call_operand.hbm [shape: f32[2,8,32], index: 16, kind: output, shape index: {}]  }
   0x1   :  { %2829 = sst [smem:[#allocation8_spill]] %s2809_s0 }
   0x2   :  { %2830 = sst [smem:[#allocation9_spill]] %s2810_s1 }
   0x3   :  { %2831 = sst [smem:[#allocation10_spill]] %s2811_s2 }
   0x4   :  { %21 = vsyncpa [#allocation3], 0 }
   0x5   :  { %23 = vsyncpa [#allocation3 + $0x1], 0  ;;  %s2331_s21 = smov 0   ;;  %s2333_s22 = smov 0  }
   0x6   :  { %s2335_s23 = smov 0   ;;  %s2337_s24 = smov 0  }
   0x7 LB: > { %2832 = sst [smem:[#allocation5_spill]] %s2234_s23  ;;  %s2352_s25 = sadd.s32 4294967295, %s2238_s24   ;;  %s2238_s24 = sphi %s2337_s24, %s2840_s24   ;;  %s2234_s23 = sphi %s2335_s23, %s2842_s23   ;;  %s2230_s22 = sphi %s2333_s22, %s2844_s22   ;;  %s2226_s21 = sphi %s2331_s21, %s2843_s21  }
   0x8   : > { %s1941_s26 = sadd.s32 4294967294, %s2238_s24   ;;  %s2356_s27 = sadd.s32 1, %s2238_s24  }
   0x9   : > { %2833 = sst [smem:[#allocation6_spill]] %s2356_s27  ;;  %s387_s28 = sadd.s32 1, %s2234_s23 }
   0xa   : > { %s384_s29 = ssub.s32 %s2238_s24, %s2356_s27  ;;  %p397_p0 = scmp.ne.s32.totalorder %s2234_s23, %s2230_s22 }
   0xb   : > { %p385_p1 = scmp.eq.s32.totalorder %s384_s29, 0  ;;  %p398_p2 = scmp.eq.s32.totalorder %s2352_s25, 1 }
   0xc   : > { %p403_p3 = scmp.ne.s32.totalorder %s2230_s22, %s2226_s21  ;;  %p404_p4 = scmp.eq.s32.totalorder %s1941_s26, 1 }
   0xd   : > { %s2367_s30 = scalar_select %p385_p1, %s2234_s23, %s387_s28  }
   0xe   : > { %p2369_p5 = por %p398_p2, %p397_p0  ;;  %p2373_p6 = por %p404_p4, %p403_p3 }
   0xf   : > { %2834 = sst [smem:[#allocation7_spill]] %s2367_s30  ;;  %p1944_p7 = scmp.ge.s32.totalorder %s2238_s24, 1 }
  0x10   : > { %p483_p8 = scmp.lt.s32.totalorder %s2238_s24, 3 }
  0x12   : > { %p484_p9 = pnand %p1944_p7, %p483_p8 }
  0x13   : > { %p541_p10 = scmp.lt.s32.totalorder (!%p484_p9), %s2352_s25, 1  ;;  %s2837_s1 = sld [smem:[#allocation9_spill]] (!%p484_p9) }
  0x14   : > { %487 = sbr.rel (%p484_p9) target bundleno = 3681 (0xe61), region = 84  ;;  %s2838_s23 = sld [smem:[#allocation8_spill]] (!%p484_p9) }
  0x15   : > { %s2243_s30 = smov (!%p484_p9), 80   ;;  %s2839_s2 = sld [smem:[#allocation10_spill]] (!%p484_p9) }
  0x16   : > { %s2196_s29 = scalar_lea.hbm (!%p484_p9), %s2825_s16, 16 }
  0x19   : > { %v2240_v0 = vmov 0   ;;  %s2381_s18 = scalar_select %p541_p10, %s2352_s25, 1  ;;  %v2399_v61 = vld [vmem:[%s2817_s8 + $0x8] sm:$0xff]  ;;  %v2405_v62 = vld [vmem:[%s2817_s8] sm:$0xff]  ;;  %vm705_vm0 = vcmask 130048   ;;  %vm812_vm1 = vcmask 261120  }
  0x1a   : > { %2062 = vset.pattern.permute.xlu1 %v2240_v0  ;;  %2061 = vset.pattern.permute.xlu0 %v2240_v0  ;;  %v2074_v63 = vpack.i.bf16 %v2405_v62, %v2399_v61 }
  0x1b   : > { %2063 = vset.pattern.permute.xlu2 %v2240_v0  ;;  %s2010_s19 = sshll.u32 %s2381_s18, 5  ;;  %732 = vmatpush.msra.mxu0 %v2399_v61 }
  0x1c   : > { %s550_s28 = scalar_lea.vmem %s2837_s1, %s2010_s19  ;;  %s2390_s27 = scalar_lea.vmem %s2838_s23, %s2010_s19 }
  0x1d   : > { %v558_v1 = vld [vmem:[%s550_s28] sm:$0xff]  ;;  %v559_v4 = vld [vmem:[%s550_s28 + $0x8] sm:$0xff]  ;;  %v560_v5 = vld [vmem:[%s550_s28 + $0x10] sm:$0xff]  ;;  %733 = vmatpush.msra.mxu0 %v2405_v62  ;;  %s2242_s23 = smov 96   ;;  %s553_s19 = scalar_lea.vmem %s2839_s2, %s2381_s18 }
  0x1e   : > { %v554_v2 = vld [vmem:[%s2390_s27] sm:$0xff]  ;;  %v562_v3 = vand.u32 2147483647, %v558_v1  ;;  %v561_v6 = vld [vmem:[%s550_s28 + $0x18] sm:$0xff]  ;;  %v563_v7 = vand.u32 2147483647, %v559_v4 }
  0x1f   : > { %617 = vperm.xlu0 %2061, %v554_v2   ;;  %v564_v8 = vand.u32 2147483647, %v560_v5  ;;  %v565_v9 = vand.u32 2147483647, %v561_v6  ;;  %v555_v40 = vld [vmem:[%s2390_s27 + $0x8] sm:$0xff]  ;;  %v556_v53 = vld [vmem:[%s2390_s27 + $0x10] sm:$0xff] }
  0x20   : > { %2094 = vlog2.f32 %v562_v3  ;;  %v557_v57 = vld [vmem:[%s2390_s27 + $0x18] sm:$0xff]  ;;  %v614_v2 = vld [vmem:[%s2815_s6] sm:$0x7]  ;;  %s2241_s28 = smov 112   ;;  %s538_s27 = sand.u32 1, %s2230_s22  }
  0x21   : > { %2096 = vlog2.f32 %v563_v7 }
  0x22   : > { %2098 = vlog2.f32 %v564_v8 }
  0x23   : > { %2100 = vlog2.f32 %v565_v9 }
  0x26   : > { %v2095_v10 = vpop.eup %2094 }
  0x27   : > { %v2097_v11 = vpop.eup %2096  ;;  %v567_v12 = vmul.f32 0.6931472, %v2095_v10 }
  0x28   : > { %v2099_v13 = vpop.eup %2098  ;;  %v569_v14 = vmul.f32 0.6931472, %v2097_v11 }
  0x29   : > { %v2101_v15 = vpop.eup %2100  ;;  %v574_v16 = vmul.f32 0.4342945, %v567_v12  ;;  %v571_v17 = vmul.f32 0.6931472, %v2099_v13 }
  0x2a   : > { %v575_v18 = vmul.f32 0.4342945, %v569_v14  ;;  %v573_v19 = vmul.f32 0.6931472, %v2101_v15 }
  0x2b   : > { %v578_v20 = vfloor.f32 %v574_v16  ;;  %v576_v21 = vmul.f32 0.4342945, %v571_v17 }
  0x2c   : > { %v579_v22 = vfloor.f32 %v575_v18  ;;  %v577_v23 = vmul.f32 0.4342945, %v573_v19 }
  0x2d   : > { %v606_v24 = vadd.f32 1.0, %v578_v20  ;;  %v582_v25 = vsub.f32 0.0, %v578_v20  ;;  %v580_v26 = vfloor.f32 %v576_v21 }
  0x2e   : > { %v583_v27 = vsub.f32 0.0, %v579_v22  ;;  %v581_v28 = vfloor.f32 %v577_v23  ;;  %v607_v51 = vadd.f32 1.0, %v579_v22 }
  0x2f   : > { %v610_v29 = vmul.f32 0.03125, %v606_v24  ;;  %v586_v30 = vmul.f32 2.3025851, %v582_v25  ;;  %v584_v31 = vsub.f32 0.0, %v580_v26  ;;  %v608_v56 = vadd.f32 1.0, %v580_v26 }
  0x30   : > { %v587_v32 = vmul.f32 2.3025851, %v583_v27  ;;  %v585_v33 = vsub.f32 0.0, %v581_v28  ;;  %v611_v54 = vmul.f32 0.03125, %v607_v51  ;;  %v609_v59 = vadd.f32 1.0, %v581_v28 }
  0x31   : > { %671 = vperm.xlu1 %2062, %v610_v29   ;;  %v590_v34 = vmul.f32 1.442695, %v586_v30  ;;  %v588_v35 = vmul.f32 2.3025851, %v584_v31  ;;  %v612_v58 = vmul.f32 0.03125, %v608_v56 }
  0x32   : > { %v592_v36 = vmul.f32 1.442695, %v587_v32  ;;  %v589_v37 = vmul.f32 2.3025851, %v585_v33  ;;  %v613_v60 = vmul.f32 0.03125, %v609_v59 }
  0x33   : > { %2102 = vpow2.f32 %v590_v34  ;;  %v594_v38 = vmul.f32 1.442695, %v588_v35 }
  0x34   : > { %2104 = vpow2.f32 %v592_v36  ;;  %v596_v39 = vmul.f32 1.442695, %v589_v37 }
  0x35   : > { %2106 = vpow2.f32 %v594_v38 }
  0x36   : > { %2108 = vpow2.f32 %v596_v39 }
  0x39   : > { %v2103_v41 = vpop.eup %2102  ;;  %622 = vperm.xlu1 %2062, %v555_v40  }
  0x3a   : > { %v2105_v42 = vpop.eup %2104  ;;  %v598_v43 = vmul.f32 %v2103_v41, %v558_v1 }
  0x3b   : > { %v2107_v44 = vpop.eup %2106  ;;  %v599_v45 = vmul.f32 %v2105_v42, %v559_v4  ;;  %v660_v4 = vperm.slane %v614_v2, 1 }
  0x3c   : > { %v602_v46 = vmul.f32 0.1, %v598_v43  ;;  %v600_v47 = vmul.f32 %v2107_v44, %v560_v5  ;;  %v2109_v49 = vpop.eup %2108  ;;  %v635_v5 = vperm.slane %v614_v2, 0 }
  0x3d   : > { %v603_v48 = vmul.f32 0.1, %v599_v45  ;;  %v601_v52 = vmul.f32 %v2109_v49, %v561_v6  ;;  %v689_v6 = vperm.slane %v614_v2, 2 }
  0x3e   : > { %642 = vperm.xlu0 %2061, %v602_v46   ;;  %v604_v50 = vmul.f32 0.1, %v600_v47  ;;  %v699_v46 = vld [vmem:[%s2813_s4 + $0x8] sm:$0xff]  ;;  %v698_v47 = vld [vmem:[%s2813_s4] sm:$0xff] }
  0x3f   : > { %647 = vperm.xlu2 %2063, %v603_v48   ;;  %v605_v55 = vmul.f32 0.1, %v601_v52 }
  0x41   : > { %652 = vperm.xlu1 %2062, %v604_v50  }
  0x46   : > { %627 = vperm.xlu0 %2061, %v556_v53  }
  0x47   : > { %676 = vperm.xlu2 %2063, %v611_v54  }
  0x49   : > { %657 = vperm.xlu1 %2062, %v605_v55   ;;  %v700_v55 = vld [vmem:[%s2813_s4 + $0x10] sm:$0xff] }
  0x4e   : > { %632 = vperm.xlu0 %2061, %v557_v57  }
  0x4f   : > { %681 = vperm.xlu2 %2063, %v612_v58  }
  0x57   : > { %686 = vperm.xlu2 %2063, %v613_v60   ;;  %v701_v60 = vld [vmem:[%s2813_s4 + $0x18] sm:$0xff] }
  0x91   : > { %v618_v1 = vpop.permute.xlu0 %617 }
  0x92   : > { %v636_v9 = vmul.f32 %v635_v5, %v618_v1 }
  0x99   : > { %v648_v3 = vpop.permute.xlu2 %647 }
  0x9a   : > { %v662_v14 = vmul.f32 %v660_v4, %v648_v3 }
  0xa1   : > { %v677_v13 = vpop.permute.xlu2 %676 }
  0xa2   : > { %v691_v18 = vmul.f32 %v689_v6, %v677_v13 }
  0xa3   : > { %v672_v0 = vpop.permute.xlu1 %671 }
  0xa4   : > { %v690_v11 = vmul.f32 %v689_v6, %v672_v0 }
  0xa9   : > { %v682_v23 = vpop.permute.xlu2 %681 }
  0xaa   : > { %v692_v27 = vmul.f32 %v689_v6, %v682_v23 }
  0xab   : > { %v623_v7 = vpop.permute.xlu1 %622 }
  0xac   : > { %v637_v15 = vmul.f32 %v635_v5, %v623_v7 }
  0xae   : > { %v666_v19 = vadd.f32 %v662_v14, %v637_v15 }
  0xb0   : > { %v643_v8 = vpop.permute.xlu0 %642  ;;  %v2417_v22 = vadd.f32 %v691_v18, %v666_v19 }
  0xb1   : > { %v661_v10 = vmul.f32 %v660_v4, %v643_v8  ;;  %v687_v32 = vpop.permute.xlu2 %686 }
  0xb2   : > { %v693_v34 = vmul.f32 %v689_v6, %v687_v32 }
  0xb3   : > { %v665_v12 = vadd.f32 %v661_v10, %v636_v9  ;;  %v653_v20 = vpop.permute.xlu1 %652 }
  0xb4   : > { %v663_v24 = vmul.f32 %v660_v4, %v653_v20 }
  0xb5   : > { %v2413_v16 = vadd.f32 %v690_v11, %v665_v12 }
  0xb7   : > { %1950 = vmatmul.msk.f32.vlgmr.msra.gmra.mxu0 %vm705_vm0, %v2413_v16 }
  0xb8   : > { %v628_v17 = vpop.permute.xlu0 %627 }
  0xb9   : > { %v638_v21 = vmul.f32 %v635_v5, %v628_v17 }
  0xbb   : > { %v667_v25 = vadd.f32 %v663_v24, %v638_v21  ;;  %v658_v28 = vpop.permute.xlu1 %657 }
  0xbc   : > { %v664_v31 = vmul.f32 %v660_v4, %v658_v28 }
  0xbd   : > { %v2421_v30 = vadd.f32 %v692_v27, %v667_v25 }
  0xbf   : > { %1951 = vmatmul.msk.f32.gmra.mxu0 %vm705_vm0, %v2417_v22 }
  0xc0   : > { %v633_v26 = vpop.permute.xlu0 %632 }
  0xc1   : > { %v639_v29 = vmul.f32 %v635_v5, %v633_v26 }
  0xc3   : > { %v668_v33 = vadd.f32 %v664_v31, %v639_v29 }
  0xc5   : > { %v2425_v35 = vadd.f32 %v693_v34, %v668_v33 }
  0xc7   : > { %1952 = vmatmul.msk.f32.gmra.mxu0 %vm705_vm0, %v2421_v30 }
  0xcf   : > { %1953 = vmatmul.msk.f32.gmra.mxu0 %vm705_vm0, %v2425_v35 }
 0x134   : > { %v735_v36 = vpop.f32.mrf.mxu0 }
 0x13c   : > { %v738_v37 = vpop.f32.mrf.mxu0 }
 0x13d   : > { %753 = vrot.lane.b32.xlu2 %v738_v37, %s2241_s28  ;;  %v2069_v3 = vpack.i.bf16 %v735_v36, %v738_v37 }
 0x144   : > { %v741_v38 = vpop.f32.mrf.mxu0 }
 0x145   : > { %755 = vrot.lane.b32.xlu1 %v741_v38, %s2241_s28 }
 0x14c   : > { %v744_v39 = vpop.f32.mrf.mxu0 }
 0x14d   : > { %757 = vrot.lane.b32.xlu0 %v744_v39, %s2241_s28  ;;  %v2064_v4 = vpack.i.bf16 %v741_v38, %v744_v39 }
 0x155   : > { %751 = vrot.lane.b32.xlu0 %v735_v36, %s2241_s28 }
 0x197   : > { %v754_v42 = vpop.permute.xlu2 %753 }
 0x1b7   : > { %v756_v41 = vpop.permute.xlu1 %755 }
 0x1bf   : > { %v758_v40 = vpop.permute.xlu0 %757 }
 0x1c0   : > { %1954 = vmatpush.xpose.msk.msrb.mxu0 %vm705_vm0, %v758_v40  ;;  %2012 = vmatpush.xpose.msk.msra.mxu1 %vm705_vm0, %v758_v40 }
 0x1c4   : > { %1955 = vmatpush.xpose.msk.msrb.mxu0 %vm705_vm0, %v756_v41  ;;  %2013 = vmatpush.xpose.msk.msra.mxu1 %vm705_vm0, %v756_v41 }
 0x1c7   : > { %v752_v43 = vpop.permute.xlu0 %751 }
 0x1c8   : > { %1956 = vmatpush.xpose.msk.msrb.mxu0 %vm705_vm0, %v754_v42  ;;  %2014 = vmatpush.xpose.msk.msra.mxu1 %vm705_vm0, %v754_v42 }
 0x1cc   : > { %1957 = vmatpush.xpose.msk.msrb.mxu0 %vm705_vm0, %v752_v43  ;;  %2015 = vmatpush.xpose.msk.msra.mxu1 %vm705_vm0, %v752_v43 }
 0x1cf   : > { %1958 = vmatmul.msk.f32.vlgmr.msrb.gmra.mxu0 %vm705_vm0, %v735_v36  ;;  %1959 = vmatmul.msk.f32.vlgmr.msra.gmra.mxu1 %vm705_vm0, %v738_v37 }
 0x1d7   : > { %1960 = vmatmul.msk.f32.gmra.mxu1 %vm705_vm0, %v741_v38 }
 0x1df   : > { %1961 = vmatmul.msk.f32.gmra.mxu1 %vm705_vm0, %v744_v39 }
 0x24c   : > { %v792_v44 = vpop.f32.mrf.mxu0  ;;  %v795_v45 = vpop.f32.mrf.mxu1 }
 0x24d   : > { %v804_v48 = vmul.f32 0.25, %v792_v44  ;;  %v805_v49 = vmul.f32 0.25, %v795_v45 }
 0x24f   : > { %v809_v50 = vadd.f32 %v805_v49, %v699_v46  ;;  %v808_v51 = vadd.f32 %v804_v48, %v698_v47 }
 0x251   : > { %v816_v52 = vsel %vm812_vm1, %v809_v50, -inf  ;;  %v813_v53 = vsel %vm812_vm1, %v808_v51, -inf }
 0x252   : > { %817 = vmax.xlane.f32.xlu2 %v816_v52  ;;  %814 = vmax.xlane.f32.xlu1 %v813_v53 }
 0x254   : > { %v798_v54 = vpop.f32.mrf.mxu1 }
 0x255   : > { %v806_v56 = vmul.f32 0.25, %v798_v54 }
 0x257   : > { %v810_v57 = vadd.f32 %v806_v56, %v700_v55 }
 0x259   : > { %v819_v58 = vsel %vm812_vm1, %v810_v57, -inf }
 0x25a   : > { %820 = vmax.xlane.f32.xlu0 %v819_v58 }
 0x25c   : > { %v801_v59 = vpop.f32.mrf.mxu1 }
 0x25d   : > { %v807_v0 = vmul.f32 0.25, %v801_v59 }
 0x25f   : > { %v811_v1 = vadd.f32 %v807_v0, %v701_v60 }
 0x261   : > { %v822_v2 = vsel %vm812_vm1, %v811_v1, -inf }
 0x262   : > { %823 = vmax.xlane.f32.xlu2 %v822_v2 }
 0x26e   : > { %2070 = vrot.lane.b32.xlu0 %v2069_v3, %s2242_s23 }
 0x276   : > { %2075 = vrot.lane.b32.xlu0 %v2074_v63, %s2243_s30 }
 0x27a   : > { %2065 = vrot.lane.b32.xlu2 %v2064_v4, %s2242_s23 }
 0x2c5   : > { %v815_v5 = vpop.xlane.xlu1 %814  ;;  %v818_v6 = vpop.xlane.xlu2 %817 }
 0x2c6   : > { %v825_v7 = vsub.f32 %v808_v51, %v815_v5  ;;  %v826_v9 = vsub.f32 %v809_v50, %v818_v6 }
 0x2c8   : > { %v829_v8 = vmul.f32 1.442695, %v825_v7  ;;  %v831_v10 = vmul.f32 1.442695, %v826_v9 }
 0x2ca   : > { %2110 = vpow2.f32 %v829_v8 }
 0x2cb   : > { %2112 = vpow2.f32 %v831_v10 }
 0x2cd   : > { %v821_v11 = vpop.xlane.xlu0 %820 }
 0x2ce   : > { %v827_v13 = vsub.f32 %v810_v57, %v821_v11 }
 0x2d0   : > { %v2111_v12 = vpop.eup %2110  ;;  %v833_v15 = vmul.f32 1.442695, %v827_v13 }
 0x2d1   : > { %v837_v14 = vsel %vm812_vm1, %v2111_v12, 0.0  ;;  %v2113_v18 = vpop.eup %2112 }
 0x2d2   : > { %838 = vadd.xlane.f32.xlu1 %v837_v14  ;;  %2114 = vpow2.f32 %v833_v15  ;;  %v840_v20 = vsel %vm812_vm1, %v2113_v18, 0.0 }
 0x2d5   : > { %v824_v17 = vpop.xlane.xlu2 %823 }
 0x2d6   : > { %v828_v19 = vsub.f32 %v811_v1, %v824_v17  ;;  %v2244_v1 = vmov 16.0  }
 0x2d8   : > { %v835_v21 = vmul.f32 1.442695, %v828_v19  ;;  %v2115_v25 = vpop.eup %2114 }
 0x2d9   : > { %v843_v29 = vsel %vm812_vm1, %v2115_v25, 0.0 }
 0x2da   : > { %841 = vadd.xlane.f32.xlu1 %v840_v20  ;;  %2116 = vpow2.f32 %v835_v21 }
 0x2dd   : > { %v2066_v23 = vpop.permute.xlu2 %2065 }
 0x2de   : > { %v2067_v24 = vunpack.i.l.bf16 %v2066_v23  ;;  %v2068_v27 = vunpack.i.h.bf16 %v2066_v23 }
 0x2e0   : > { %v2071_v26 = vpop.permute.xlu0 %2070  ;;  %893 = vmatpush.msra.mxu2 %v2067_v24  ;;  %v2117_v61 = vpop.eup %2116 }
 0x2e1   : > { %v2072_v28 = vunpack.i.l.bf16 %v2071_v26  ;;  %v2073_v31 = vunpack.i.h.bf16 %v2071_v26  ;;  %v846_v62 = vsel %vm812_vm1, %v2117_v61, 0.0 }
 0x2e2   : > { %894 = vmatpush.msra.mxu2 %v2068_v27  ;;  %844 = vadd.xlane.f32.xlu1 %v843_v29  ;;  %v1069_v27 = vld [vmem:[%s2818_s9 + $0x8] sm:$0xff] }
 0x2e3   : > { %1097 = vmatpush.msra.mxu0 %v1069_v27 }
 0x2e4   : > { %895 = vmatpush.msra.mxu2 %v2072_v28  ;;  %v1068_v28 = vld [vmem:[%s2818_s9] sm:$0xff] }
 0x2e5   : > { %1098 = vmatpush.msra.mxu0 %v1068_v28 }
 0x2e6   : > { %896 = vmatpush.msra.mxu2 %v2073_v31 }
 0x2e8   : > { %v2076_v32 = vpop.permute.xlu0 %2075 }
 0x2e9   : > { %v2077_v33 = vunpack.i.l.bf16 %v2076_v32  ;;  %v2078_v46 = vunpack.i.h.bf16 %v2076_v32 }
 0x2ea   : > { %847 = vadd.xlane.f32.xlu1 %v846_v62 }
 0x2eb   : > { %944 = vmatpush.msra.mxu3 %v2077_v33 }
 0x2ed   : > { %945 = vmatpush.msra.mxu3 %v2078_v46 }
 0x345   : > { %v839_v63 = vpop.xlane.xlu1 %838 }
 0x346   : > { %2118 = vrcp.f32 %v839_v63 }
 0x34c   : > { %v2119_v34 = vpop.eup %2118 }
 0x34d   : > { %v842_v36 = vpop.xlane.xlu1 %841  ;;  %v853_v37 = vmul.f32 %v2119_v34, %v2111_v12 }
 0x34e   : > { %2120 = vrcp.f32 %v842_v36 }
 0x34f   : > { %1962 = vmatmul.msk.f32.vlgmr.msra.gmra.mxu2 %vm812_vm1, %v853_v37 }
 0x354   : > { %v2121_v38 = vpop.eup %2120 }
 0x355   : > { %v845_v39 = vpop.xlane.xlu1 %844  ;;  %v854_v40 = vmul.f32 %v2121_v38, %v2113_v18 }
 0x356   : > { %2122 = vrcp.f32 %v845_v39 }
 0x357   : > { %1963 = vmatmul.msk.f32.gmra.mxu2 %vm812_vm1, %v854_v40  ;;  %v2521_v40 = vld [vmem:[%s2820_s11] sm:$0x3f] }
 0x358   : > { %v1058_v46 = vperm.slane %v2521_v40, 2 }
 0x35c   : > { %v2123_v41 = vpop.eup %2122 }
 0x35d   : > { %v848_v42 = vpop.xlane.xlu1 %847  ;;  %v855_v43 = vmul.f32 %v2123_v41, %v2115_v25 }
 0x35e   : > { %2124 = vrcp.f32 %v848_v42 }
 0x35f   : > { %1964 = vmatmul.msk.f32.gmra.mxu2 %vm812_vm1, %v855_v43  ;;  %2126 = vrcp.f32 %v2244_v1 }
 0x364   : > { %v2125_v44 = vpop.eup %2124 }
 0x365   : > { %v856_v45 = vmul.f32 %v2125_v44, %v2117_v61  ;;  %v2127_v2 = vpop.eup %2126 }
 0x366   : > { %v976_v3 = vmul.f32 16.0, %v2127_v2  ;;  %vm980_vm2 = vweird.f32 %v2127_v2 }
 0x367   : > { %1965 = vmatmul.msk.f32.gmra.mxu2 %vm812_vm1, %v856_v45 }
 0x3d2   : > { %v898_v47 = vpop.f32.mrf.mxu2 }
 0x3d3   : > { %1966 = vmatmul.msk.f32.vlgmr.msra.gmra.mxu3 %vm705_vm0, %v898_v47  ;;  %v1117_v47 = vld [vmem:[%s2819_s10 + $0x8] sm:$0xff] }
 0x3d4   : > { %1145 = vmatpush.msrb.mxu3 %v1117_v47 }
 0x3da   : > { %v901_v48 = vpop.f32.mrf.mxu2 }
 0x3db   : > { %1967 = vmatmul.msk.f32.gmra.mxu3 %vm705_vm0, %v901_v48 }
 0x3e2   : > { %v904_v49 = vpop.f32.mrf.mxu2 }
 0x3e3   : > { %1968 = vmatmul.msk.f32.gmra.mxu3 %vm705_vm0, %v904_v49 }
 0x3ea   : > { %v907_v50 = vpop.f32.mrf.mxu2 }
 0x3eb   : > { %1969 = vmatmul.msk.f32.gmra.mxu3 %vm705_vm0, %v907_v50 }
 0x456   : > { %v947_v51 = vpop.f32.mrf.mxu3 }
 0x457   : > { %v959_v52 = vadd.f32 %v947_v51, %v2413_v16  ;;  %v1063_v51 = vperm.slane %v2521_v40, 3 }
 0x459   : > { %v963_v53 = vsel %vm705_vm0, %v959_v52, 0.0 }
 0x45a   : > { %964 = vadd.xlane.f32.xlu2 %v963_v53 }
 0x45e   : > { %v950_v54 = vpop.f32.mrf.mxu3 }
 0x45f   : > { %v960_v55 = vadd.f32 %v950_v54, %v2417_v22  ;;  %v977_v22 = vsub.f32 1.0, %v976_v3 }
 0x461   : > { %v966_v56 = vsel %vm705_vm0, %v960_v55, 0.0  ;;  %v978_v4 = vmul.f32 %v2127_v2, %v977_v22 }
 0x462   : > { %967 = vadd.xlane.f32.xlu1 %v966_v56 }
 0x463   : > { %v979_v5 = vadd.f32 %v2127_v2, %v978_v4 }
 0x465   : > { %v2487_v6 = vsel %vm980_vm2, %v2127_v2, %v979_v5 }
 0x466   : > { %v953_v57 = vpop.f32.mrf.mxu3 }
 0x467   : > { %v961_v58 = vadd.f32 %v953_v57, %v2421_v30 }
 0x469   : > { %v969_v59 = vsel %vm705_vm0, %v961_v58, 0.0 }
 0x46a   : > { %970 = vadd.xlane.f32.xlu0 %v969_v59 }
 0x46e   : > { %v956_v60 = vpop.f32.mrf.mxu3 }
 0x46f   : > { %v962_v0 = vadd.f32 %v956_v60, %v2425_v35 }
 0x471   : > { %v972_v16 = vsel %vm705_vm0, %v962_v0, 0.0 }
 0x472   : > { %973 = vadd.xlane.f32.xlu1 %v972_v16 }
 0x4cd   : > { %v965_v30 = vpop.xlane.xlu2 %964 }
 0x4ce   : > { %v982_v7 = vmul.f32 %v2487_v6, %v965_v30 }
 0x4d0   : > { %v986_v8 = vsub.f32 %v959_v52, %v982_v7 }
 0x4d2   : > { %v990_v9 = vmul.f32 %v986_v8, %v986_v8 }
 0x4d4   : > { %v994_v35 = vsel %vm705_vm0, %v990_v9, 0.0 }
 0x4d5   : > { %995 = vadd.xlane.f32.xlu1 %v994_v35  ;;  %v968_v10 = vpop.xlane.xlu1 %967 }
 0x4d6   : > { %v983_v11 = vmul.f32 %v2487_v6, %v968_v10 }
 0x4d8   : > { %v2492_v12 = vsub.f32 %v960_v55, %v983_v11 }
 0x4da   : > { %v991_v13 = vmul.f32 %v2492_v12, %v2492_v12 }
 0x4dc   : > { %v997_v14 = vsel %vm705_vm0, %v991_v13, 0.0 }
 0x4dd   : > { %v971_v15 = vpop.xlane.xlu0 %970  ;;  %998 = vadd.xlane.f32.xlu1 %v997_v14 }
 0x4de   : > { %v984_v17 = vmul.f32 %v2487_v6, %v971_v15 }
 0x4e0   : > { %v2498_v18 = vsub.f32 %v961_v58, %v984_v17 }
 0x4e2   : > { %v992_v19 = vmul.f32 %v2498_v18, %v2498_v18 }
 0x4e4   : > { %v1000_v20 = vsel %vm705_vm0, %v992_v19, 0.0 }
 0x4e5   : > { %1001 = vadd.xlane.f32.xlu1 %v1000_v20  ;;  %v974_v21 = vpop.xlane.xlu1 %973 }
 0x4e6   : > { %v985_v23 = vmul.f32 %v2487_v6, %v974_v21 }
 0x4e8   : > { %v2504_v24 = vsub.f32 %v962_v0, %v985_v23  ;;  %v1070_v23 = vperm.slane %v2521_v40, 0 }
 0x4ea   : > { %v993_v25 = vmul.f32 %v2504_v24, %v2504_v24 }
 0x4ec   : > { %v1003_v26 = vsel %vm705_vm0, %v993_v25, 0.0 }
 0x4ed   : > { %1004 = vadd.xlane.f32.xlu1 %v1003_v26 }
 0x548   : > { %v996_v29 = vpop.xlane.xlu1 %995 }
 0x549   : > { %v1006_v31 = vmul.f32 %v996_v29, %v2487_v6 }
 0x54b   : > { %v1010_v61 = vadd.f32 1e-05, %v1006_v31 }
 0x54d   : > { %2128 = vrsqrt.f32 %v1010_v61  ;;  %vm1020_vm4 = vweird.f32 %v1010_v61 }
 0x550   : > { %v999_v62 = vpop.xlane.xlu1 %998 }
 0x551   : > { %v1007_v63 = vmul.f32 %v999_v62, %v2487_v6 }
 0x553   : > { %v2129_v32 = vpop.eup %2128  ;;  %v1011_v33 = vadd.f32 1e-05, %v1007_v63 }
 0x554   : > { %v1015_v34 = vmul.f32 %v2129_v32, %v1010_v61  ;;  %vm1021_vm3 = vweird.f32 %v2129_v32 }
 0x555   : > { %2130 = vrsqrt.f32 %v1011_v33  ;;  %vm1022_vm5 = vmor %vm1020_vm4, %vm1021_vm3  ;;  %vm1030_vm7 = vweird.f32 %v1011_v33 }
 0x556   : > { %v1016_v36 = vmul.f32 %v2129_v32, %v1015_v34  ;;  %v1118_v34 = vperm.slane %v2521_v40, 1 }
 0x558   : > { %v1017_v37 = vmul.f32 0.5, %v1016_v36  ;;  %v1002_v38 = vpop.xlane.xlu1 %1001 }
 0x559   : > { %v1008_v39 = vmul.f32 %v1002_v38, %v2487_v6 }
 0x55a   : > { %v1018_v41 = vsub.f32 1.5, %v1017_v37 }
 0x55b   : > { %v2131_v42 = vpop.eup %2130  ;;  %v1012_v43 = vadd.f32 1e-05, %v1008_v39 }
 0x55c   : > { %v1019_v44 = vmul.f32 %v2129_v32, %v1018_v41  ;;  %v1025_v45 = vmul.f32 %v2131_v42, %v1011_v33  ;;  %vm1031_vm6 = vweird.f32 %v2131_v42 }
 0x55d   : > { %2132 = vrsqrt.f32 %v1012_v43  ;;  %vm1032_vm8 = vmor %vm1030_vm7, %vm1031_vm6  ;;  %vm1040_vm10 = vweird.f32 %v1012_v43 }
 0x55e   : > { %v1023_v48 = vsel %vm1022_vm5, %v2129_v32, %v1019_v44  ;;  %v1026_v49 = vmul.f32 %v2131_v42, %v1025_v45 }
 0x55f   : > { %v1054_v50 = vmul.f32 %v1023_v48, %v986_v8 }
 0x560   : > { %v1027_v52 = vmul.f32 0.5, %v1026_v49  ;;  %v1005_v53 = vpop.xlane.xlu1 %1004 }
 0x561   : > { %v1059_v54 = vmul.f32 %v1058_v46, %v1054_v50  ;;  %v1009_v55 = vmul.f32 %v1005_v53, %v2487_v6 }
 0x562   : > { %v1028_v56 = vsub.f32 1.5, %v1027_v52 }
 0x563   : > { %v2133_v57 = vpop.eup %2132  ;;  %v1013_v58 = vadd.f32 1e-05, %v1009_v55  ;;  %v1064_v59 = vadd.f32 %v1063_v51, %v1059_v54 }
 0x564   : > { %v1029_v60 = vmul.f32 %v2131_v42, %v1028_v56  ;;  %v1035_v0 = vmul.f32 %v2133_v57, %v1012_v43  ;;  %vm1041_vm9 = vweird.f32 %v2133_v57 }
 0x565   : > { %2134 = vrsqrt.f32 %v1013_v58  ;;  %1970 = vmatmul.msk.f32.vlgmr.msra.gmra.mxu0 %vm705_vm0, %v1064_v59  ;;  %vm1042_vm11 = vmor %vm1040_vm10, %vm1041_vm9  ;;  %vm1050_vm13 = vweird.f32 %v1013_v58 }
 0x566   : > { %v1033_v16 = vsel %vm1032_vm8, %v2131_v42, %v1029_v60  ;;  %v1036_v1 = vmul.f32 %v2133_v57, %v1035_v0 }
 0x567   : > { %v1055_v2 = vmul.f32 %v1033_v16, %v2492_v12 }
 0x568   : > { %v1037_v3 = vmul.f32 0.5, %v1036_v1 }
 0x569   : > { %v1060_v22 = vmul.f32 %v1058_v46, %v1055_v2 }
 0x56a   : > { %v1038_v4 = vsub.f32 1.5, %v1037_v3 }
 0x56b   : > { %v2135_v5 = vpop.eup %2134  ;;  %v1065_v30 = vadd.f32 %v1063_v51, %v1060_v22 }
 0x56c   : > { %v1039_v7 = vmul.f32 %v2133_v57, %v1038_v4  ;;  %v1045_v8 = vmul.f32 %v2135_v5, %v1013_v58  ;;  %vm1051_vm12 = vweird.f32 %v2135_v5 }
 0x56d   : > { %1971 = vmatmul.msk.f32.gmra.mxu0 %vm705_vm0, %v1065_v30  ;;  %vm1052_vm14 = vmor %vm1050_vm13, %vm1051_vm12 }
 0x56e   : > { %v1043_v9 = vsel %vm1042_vm11, %v2133_v57, %v1039_v7  ;;  %v1046_v35 = vmul.f32 %v2135_v5, %v1045_v8 }
 0x56f   : > { %v1056_v10 = vmul.f32 %v1043_v9, %v2498_v18  ;;  %v1116_v18 = vld [vmem:[%s2819_s10] sm:$0xff] }
 0x570   : > { %v1047_v11 = vmul.f32 0.5, %v1046_v35  ;;  %1146 = vmatpush.msrb.mxu3 %v1116_v18  ;;  %v2572_v35 = vld [vmem:[%s2821_s12 + $0x8] sm:$0xff] }
 0x571   : > { %v1061_v13 = vmul.f32 %v1058_v46, %v1056_v10  ;;  %1303 = vmatpush.msrb.mxu2 %v2572_v35  ;;  %v2578_v10 = vld [vmem:[%s2821_s12] sm:$0xff] }
 0x572   : > { %v1048_v14 = vsub.f32 1.5, %v1047_v11  ;;  %v2089_v18 = vpack.i.bf16 %v2578_v10, %v2572_v35 }
 0x573   : > { %v1066_v12 = vadd.f32 %v1063_v51, %v1061_v13  ;;  %1304 = vmatpush.msrb.mxu2 %v2578_v10 }
 0x574   : > { %v1049_v15 = vmul.f32 %v2135_v5, %v1048_v14 }
 0x575   : > { %1972 = vmatmul.msk.f32.gmra.mxu0 %vm705_vm0, %v1066_v12 }
 0x576   : > { %v1053_v17 = vsel %vm1052_vm14, %v2135_v5, %v1049_v15 }
 0x577   : > { %v1057_v19 = vmul.f32 %v1053_v17, %v2504_v24 }
 0x579   : > { %v1062_v20 = vmul.f32 %v1058_v46, %v1057_v19 }
 0x57b   : > { %v1067_v21 = vadd.f32 %v1063_v51, %v1062_v20 }
 0x57d   : > { %1973 = vmatmul.msk.f32.gmra.mxu0 %vm705_vm0, %v1067_v21 }
 0x5e2   : > { %v1100_v25 = vpop.f32.mrf.mxu0 }
 0x5e3   : > { %v1101_v26 = vadd.f32 %v1100_v25, %v1070_v23 }
 0x5e5   : > { %v1112_v27 = vmax.f32 %v1101_v26, 0.0 }
 0x5e7   : > { %1974 = vmatmul.msk.f32.vlgmr.msrb.gmra.mxu3 %vm705_vm0, %v1112_v27 }
 0x5ea   : > { %v1103_v28 = vpop.f32.mrf.mxu0 }
 0x5eb   : > { %v1104_v29 = vadd.f32 %v1103_v28, %v1070_v23 }
 0x5ed   : > { %v1113_v31 = vmax.f32 %v1104_v29, 0.0 }
 0x5ef   : > { %1975 = vmatmul.msk.f32.gmra.mxu3 %vm705_vm0, %v1113_v31 }
 0x5f2   : > { %v1106_v24 = vpop.f32.mrf.mxu0 }
 0x5f3   : > { %v1107_v61 = vadd.f32 %v1106_v24, %v1070_v23 }
 0x5f5   : > { %v1114_v62 = vmax.f32 %v1107_v61, 0.0  ;;  %v1252_v61 = vperm.slane %v2521_v40, 4 }
 0x5f7   : > { %1976 = vmatmul.msk.f32.gmra.mxu3 %vm705_vm0, %v1114_v62 }
 0x5fa   : > { %v1109_v63 = vpop.f32.mrf.mxu0 }
 0x5fb   : > { %v1110_v32 = vadd.f32 %v1109_v63, %v1070_v23 }
 0x5fd   : > { %v1115_v33 = vmax.f32 %v1110_v32, 0.0 }
 0x5ff   : > { %1977 = vmatmul.msk.f32.gmra.mxu3 %vm705_vm0, %v1115_v33  ;;  %v1257_v33 = vperm.slane %v2521_v40, 5 }
 0x66a   : > { %v1148_v36 = vpop.f32.mrf.mxu3 }
 0x66b   : > { %v1149_v37 = vadd.f32 %v1148_v36, %v1118_v34 }
 0x66d   : > { %v1160_v38 = vadd.f32 %v1149_v37, %v1064_v59 }
 0x66f   : > { %v1164_v39 = vsel %vm705_vm0, %v1160_v38, 0.0 }
 0x670   : > { %1165 = vadd.xlane.f32.xlu2 %v1164_v39 }
 0x672   : > { %v1151_v41 = vpop.f32.mrf.mxu3 }
 0x673   : > { %v1152_v42 = vadd.f32 %v1151_v41, %v1118_v34  ;;  %v1262_v41 = vld [vmem:[%s2812_s3] sm:$0xff] }
 0x675   : > { %v1161_v43 = vadd.f32 %v1152_v42, %v1065_v30 }
 0x677   : > { %v1167_v44 = vsel %vm705_vm0, %v1161_v43, 0.0 }
 0x678   : > { %1168 = vadd.xlane.f32.xlu0 %v1167_v44 }
 0x67a   : > { %v1154_v45 = vpop.f32.mrf.mxu3 }
 0x67b   : > { %v1155_v46 = vadd.f32 %v1154_v45, %v1118_v34 }
 0x67d   : > { %v1162_v47 = vadd.f32 %v1155_v46, %v1066_v12 }
 0x67f   : > { %v1170_v48 = vsel %vm705_vm0, %v1162_v47, 0.0 }
 0x680   : > { %1171 = vadd.xlane.f32.xlu1 %v1170_v48 }
 0x682   : > { %v1157_v49 = vpop.f32.mrf.mxu3 }
 0x683   : > { %v1158_v50 = vadd.f32 %v1157_v49, %v1118_v34 }
 0x685   : > { %v1163_v51 = vadd.f32 %v1158_v50, %v1067_v21 }
 0x687   : > { %v1173_v52 = vsel %vm705_vm0, %v1163_v51, 0.0 }
 0x688   : > { %1174 = vadd.xlane.f32.xlu2 %v1173_v52 }
 0x6e3   : > { %v1166_v53 = vpop.xlane.xlu2 %1165 }
 0x6e4   : > { %v1176_v54 = vmul.f32 %v1166_v53, %v2487_v6  ;;  %v1263_v53 = vld [vmem:[%s2812_s3 + $0x8] sm:$0xff] }
 0x6e6   : > { %v1180_v55 = vsub.f32 %v1160_v38, %v1176_v54 }
 0x6e8   : > { %v1184_v56 = vmul.f32 %v1180_v55, %v1180_v55 }
 0x6ea   : > { %v1188_v57 = vsel %vm705_vm0, %v1184_v56, 0.0 }
 0x6eb   : > { %1189 = vadd.xlane.f32.xlu0 %v1188_v57  ;;  %v1169_v58 = vpop.xlane.xlu0 %1168 }
 0x6ec   : > { %v1177_v59 = vmul.f32 %v1169_v58, %v2487_v6 }
 0x6ee   : > { %v2552_v60 = vsub.f32 %v1161_v43, %v1177_v59 }
 0x6f0   : > { %v1185_v0 = vmul.f32 %v2552_v60, %v2552_v60 }
 0x6f2   : > { %v1191_v16 = vsel %vm705_vm0, %v1185_v0, 0.0 }
 0x6f3   : > { %1192 = vadd.xlane.f32.xlu1 %v1191_v16  ;;  %v1172_v1 = vpop.xlane.xlu1 %1171 }
 0x6f4   : > { %v1178_v2 = vmul.f32 %v1172_v1, %v2487_v6 }
 0x6f6   : > { %v2558_v3 = vsub.f32 %v1162_v47, %v1178_v2 }
 0x6f8   : > { %v1186_v22 = vmul.f32 %v2558_v3, %v2558_v3 }
 0x6fa   : > { %v1194_v4 = vsel %vm705_vm0, %v1186_v22, 0.0  ;;  %v1264_v22 = vld [vmem:[%s2812_s3 + $0x10] sm:$0xff] }
 0x6fb   : > { %v1175_v5 = vpop.xlane.xlu2 %1174  ;;  %1195 = vadd.xlane.f32.xlu2 %v1194_v4 }
 0x6fc   : > { %v1179_v30 = vmul.f32 %v1175_v5, %v2487_v6 }
 0x6fe   : > { %v2564_v7 = vsub.f32 %v1163_v51, %v1179_v30 }
 0x700   : > { %v1187_v8 = vmul.f32 %v2564_v7, %v2564_v7 }
 0x702   : > { %v1197_v9 = vsel %vm705_vm0, %v1187_v8, 0.0 }
 0x703   : > { %1198 = vadd.xlane.f32.xlu0 %v1197_v9 }
 0x75e   : > { %v1190_v11 = vpop.xlane.xlu0 %1189 }
 0x75f   : > { %v1200_v13 = vmul.f32 %v1190_v11, %v2487_v6  ;;  %v1265_v11 = vld [vmem:[%s2812_s3 + $0x18] sm:$0xff] }
 0x761   : > { %v1204_v14 = vadd.f32 1e-05, %v1200_v13 }
 0x763   : > { %2136 = vrsqrt.f32 %v1204_v14  ;;  %vm1214_vm2 = vweird.f32 %v1204_v14 }
 0x766   : > { %v1193_v12 = vpop.xlane.xlu1 %1192 }
 0x767   : > { %v1201_v15 = vmul.f32 %v1193_v12, %v2487_v6 }
 0x769   : > { %v2137_v17 = vpop.eup %2136  ;;  %v1205_v19 = vadd.f32 1e-05, %v1201_v15 }
 0x76a   : > { %v1209_v20 = vmul.f32 %v2137_v17, %v1204_v14  ;;  %vm1215_vm15 = vweird.f32 %v2137_v17 }
 0x76b   : > { %2138 = vrsqrt.f32 %v1205_v19  ;;  %vm1216_vm3 = vmor %vm1214_vm2, %vm1215_vm15  ;;  %vm1224_vm5 = vweird.f32 %v1205_v19 }
 0x76c   : > { %v1210_v21 = vmul.f32 %v2137_v17, %v1209_v20 }
 0x76e   : > { %v1211_v23 = vmul.f32 0.5, %v1210_v21  ;;  %v1196_v25 = vpop.xlane.xlu2 %1195 }
 0x76f   : > { %v1202_v26 = vmul.f32 %v1196_v25, %v2487_v6 }
 0x770   : > { %v1212_v27 = vsub.f32 1.5, %v1211_v23 }
 0x771   : > { %v2139_v28 = vpop.eup %2138  ;;  %v1206_v29 = vadd.f32 1e-05, %v1202_v26  ;;  %v1270_v26 = vld [vmem:[%s2814_s5] sm:$0xff] }
 0x772   : > { %v1213_v31 = vmul.f32 %v2137_v17, %v1212_v27  ;;  %v1219_v24 = vmul.f32 %v2139_v28, %v1205_v19  ;;  %vm1225_vm4 = vweird.f32 %v2139_v28 }
 0x773   : > { %2140 = vrsqrt.f32 %v1206_v29  ;;  %vm1226_vm6 = vmor %vm1224_vm5, %vm1225_vm4  ;;  %vm1234_vm8 = vweird.f32 %v1206_v29 }
 0x774   : > { %v1217_v62 = vsel %vm1216_vm3, %v2137_v17, %v1213_v31  ;;  %v1220_v63 = vmul.f32 %v2139_v28, %v1219_v24  ;;  %v1271_v24 = vld [vmem:[%s2814_s5 + $0x8] sm:$0xff] }
 0x775   : > { %v1248_v32 = vmul.f32 %v1217_v62, %v1180_v55 }
 0x776   : > { %v1221_v34 = vmul.f32 0.5, %v1220_v63  ;;  %v1199_v36 = vpop.xlane.xlu0 %1198 }
 0x777   : > { %v1203_v37 = vmul.f32 %v1199_v36, %v2487_v6  ;;  %v1253_v38 = vmul.f32 %v1252_v61, %v1248_v32 }
 0x778   : > { %v1222_v39 = vsub.f32 1.5, %v1221_v34 }
 0x779   : > { %v2141_v42 = vpop.eup %2140  ;;  %v1207_v43 = vadd.f32 1e-05, %v1203_v37  ;;  %v1258_v44 = vadd.f32 %v1257_v33, %v1253_v38 }
 0x77a   : > { %v1223_v45 = vmul.f32 %v2139_v28, %v1222_v39  ;;  %v1229_v46 = vmul.f32 %v2141_v42, %v1206_v29  ;;  %vm1235_vm7 = vweird.f32 %v2141_v42  ;;  %v1273_v39 = vld [vmem:[%s2814_s5 + $0x18] sm:$0xff] }
 0x77b   : > { %2142 = vrsqrt.f32 %v1207_v43  ;;  %v2592_v40 = vadd.f32 %v1262_v41, %v1258_v44  ;;  %vm1236_vm9 = vmor %vm1234_vm8, %vm1235_vm7  ;;  %vm1244_vm11 = vweird.f32 %v1207_v43 }
 0x77c   : > { %v1227_v47 = vsel %vm1226_vm6, %v2139_v28, %v1223_v45  ;;  %v1230_v48 = vmul.f32 %v2141_v42, %v1229_v46 }
 0x77d   : > { %v1249_v49 = vmul.f32 %v1227_v47, %v2552_v60  ;;  %1978 = vmatmul.msk.f32.vlgmr.msrb.gmra.mxu2 %vm705_vm0, %v2592_v40 }
 0x77e   : > { %v1231_v50 = vmul.f32 0.5, %v1230_v48 }
 0x77f   : > { %v1254_v51 = vmul.f32 %v1252_v61, %v1249_v49 }
 0x780   : > { %v1232_v52 = vsub.f32 1.5, %v1231_v50 }
 0x781   : > { %v2143_v54 = vpop.eup %2142  ;;  %v1259_v55 = vadd.f32 %v1257_v33, %v1254_v51 }
 0x782   : > { %v1233_v56 = vmul.f32 %v2141_v42, %v1232_v52  ;;  %v1239_v57 = vmul.f32 %v2143_v54, %v1207_v43  ;;  %vm1245_vm10 = vweird.f32 %v2143_v54 }
 0x783   : > { %v2600_v58 = vadd.f32 %v1263_v53, %v1259_v55  ;;  %vm1246_vm12 = vmor %vm1244_vm11, %vm1245_vm10 }
 0x784   : > { %v1237_v59 = vsel %vm1236_vm9, %v2141_v42, %v1233_v56  ;;  %v1240_v60 = vmul.f32 %v2143_v54, %v1239_v57 }
 0x785   : > { %v1250_v0 = vmul.f32 %v1237_v59, %v2558_v3  ;;  %1979 = vmatmul.msk.f32.gmra.mxu2 %vm705_vm0, %v2600_v58 }
 0x786   : > { %v1241_v16 = vmul.f32 0.5, %v1240_v60 }
 0x787   : > { %v1255_v1 = vmul.f32 %v1252_v61, %v1250_v0 }
 0x788   : > { %v1242_v2 = vsub.f32 1.5, %v1241_v16 }
 0x789   : > { %v1260_v4 = vadd.f32 %v1257_v33, %v1255_v1 }
 0x78a   : > { %v1243_v5 = vmul.f32 %v2143_v54, %v1242_v2 }
 0x78b   : > { %v2608_v30 = vadd.f32 %v1264_v22, %v1260_v4 }
 0x78c   : > { %v1247_v8 = vsel %vm1246_vm12, %v2143_v54, %v1243_v5 }
 0x78d   : > { %v1251_v3 = vmul.f32 %v1247_v8, %v2564_v7  ;;  %1980 = vmatmul.msk.f32.gmra.mxu2 %vm705_vm0, %v2608_v30 }
 0x78f   : > { %v1256_v9 = vmul.f32 %v1252_v61, %v1251_v3 }
 0x791   : > { %v1261_v13 = vadd.f32 %v1257_v33, %v1256_v9  ;;  %v1272_v33 = vld [vmem:[%s2814_s5 + $0x10] sm:$0xff] }
 0x793   : > { %v2616_v14 = vadd.f32 %v1265_v11, %v1261_v13 }
 0x795   : > { %1981 = vmatmul.msk.f32.gmra.mxu2 %vm705_vm0, %v2616_v14 }
 0x800   : > { %v1306_v12 = vpop.f32.mrf.mxu2 }
 0x808   : > { %v1309_v15 = vpop.f32.mrf.mxu2 }
 0x809   : > { %1324 = vrot.lane.b32.xlu0 %v1309_v15, %s2241_s28  ;;  %v2084_v45 = vpack.i.bf16 %v1306_v12, %v1309_v15 }
 0x810   : > { %v1312_v17 = vpop.f32.mrf.mxu2 }
 0x811   : > { %1326 = vrot.lane.b32.xlu2 %v1312_v17, %s2241_s28 }
 0x818   : > { %v1315_v7 = vpop.f32.mrf.mxu2 }
 0x819   : > { %1322 = vrot.lane.b32.xlu2 %v1306_v12, %s2241_s28  ;;  %1328 = vrot.lane.b32.xlu1 %v1315_v7, %s2241_s28  ;;  %v2079_v44 = vpack.i.bf16 %v1312_v17, %v1315_v7  ;;  %s2245_s28 = smov 16  }
 0x86b   : > { %v1327_v20 = vpop.permute.xlu2 %1326 }
 0x873   : > { %v1323_v23 = vpop.permute.xlu2 %1322 }
 0x87b   : > { %v1325_v21 = vpop.permute.xlu0 %1324 }
 0x88b   : > { %v1329_v19 = vpop.permute.xlu1 %1328 }
 0x88c   : > { %1982 = vmatpush.xpose.msk.msrb.mxu1 %vm705_vm0, %v1329_v19 }
 0x890   : > { %1983 = vmatpush.xpose.msk.msrb.mxu1 %vm705_vm0, %v1327_v20 }
 0x894   : > { %1984 = vmatpush.xpose.msk.msrb.mxu1 %vm705_vm0, %v1325_v21 }
 0x898   : > { %1985 = vmatpush.xpose.msk.msrb.mxu1 %vm705_vm0, %v1323_v23 }
 0x89b   : > { %1986 = vmatmul.msk.f32.vlgmr.msrb.gmra.mxu1 %vm705_vm0, %v1306_v12 }
 0x8a3   : > { %1987 = vmatmul.msk.f32.gmra.mxu1 %vm705_vm0, %v1309_v15 }
 0x8ab   : > { %1988 = vmatmul.msk.f32.gmra.mxu1 %vm705_vm0, %v1312_v17 }
 0x8b3   : > { %1989 = vmatmul.msk.f32.gmra.mxu1 %vm705_vm0, %v1315_v7 }
 0x918   : > { %v1363_v25 = vpop.f32.mrf.mxu1 }
 0x919   : > { %v1375_v27 = vmul.f32 0.25, %v1363_v25 }
 0x91b   : > { %v1379_v28 = vadd.f32 %v1375_v27, %v1270_v26 }
 0x91d   : > { %v1383_v29 = vsel %vm812_vm1, %v1379_v28, -inf }
 0x91e   : > { %1384 = vmax.xlane.f32.xlu1 %v1383_v29 }
 0x920   : > { %v1366_v31 = vpop.f32.mrf.mxu1 }
 0x921   : > { %v1376_v61 = vmul.f32 0.25, %v1366_v31 }
 0x923   : > { %v1380_v62 = vadd.f32 %v1376_v61, %v1271_v24 }
 0x925   : > { %v1386_v63 = vsel %vm812_vm1, %v1380_v62, -inf }
 0x926   : > { %1387 = vmax.xlane.f32.xlu0 %v1386_v63 }
 0x928   : > { %v1369_v32 = vpop.f32.mrf.mxu1 }
 0x929   : > { %v1377_v34 = vmul.f32 0.25, %v1369_v32 }
 0x92b   : > { %v1381_v36 = vadd.f32 %v1377_v34, %v1272_v33 }
 0x92d   : > { %v1389_v37 = vsel %vm812_vm1, %v1381_v36, -inf }
 0x92e   : > { %1390 = vmax.xlane.f32.xlu2 %v1389_v37 }
 0x930   : > { %v1372_v38 = vpop.f32.mrf.mxu1 }
 0x931   : > { %v1378_v41 = vmul.f32 0.25, %v1372_v38 }
 0x933   : > { %v1382_v42 = vadd.f32 %v1378_v41, %v1273_v39 }
 0x935   : > { %v1392_v43 = vsel %vm812_vm1, %v1382_v42, -inf }
 0x936   : > { %1393 = vmax.xlane.f32.xlu1 %v1392_v43 }
 0x946   : > { %2080 = vrot.lane.b32.xlu2 %v2079_v44, %s2242_s23 }
 0x94e   : > { %2090 = vrot.lane.b32.xlu2 %v2089_v18, %s2243_s30  ;;  %s2007_s30 = sshll.u32 %s2352_s25, 3  ;;  %s1846_s25 = scalar_lea.sflag [#allocation3], %s538_s27 }
 0x94f   : > { %2085 = vrot.lane.b32.xlu1 %v2084_v45, %s2242_s23  ;;  %s1945_s23 = sshll.u32 %s538_s27, 3 }
 0x950   : > { %s540_s18 = scalar_lea.vmem [#allocation2], %s1945_s23 }
 0x951   : > { %s1858_s20 = sshll.u32 %s540_s18, 4  ;;  %s1859_s20 = int_to_ptr.vmem [resolvable:$true] %s1858_s20 }
 0x991   : > { %v1385_v46 = vpop.xlane.xlu1 %1384 }
 0x992   : > { %v1395_v47 = vsub.f32 %v1379_v28, %v1385_v46 }
 0x994   : > { %v1399_v48 = vmul.f32 1.442695, %v1395_v47 }
 0x996   : > { %2144 = vpow2.f32 %v1399_v48 }
 0x999   : > { %v1388_v49 = vpop.xlane.xlu0 %1387 }
 0x99a   : > { %v1396_v50 = vsub.f32 %v1380_v62, %v1388_v49 }
 0x99c   : > { %v2145_v51 = vpop.eup %2144  ;;  %v1401_v52 = vmul.f32 1.442695, %v1396_v50 }
 0x99d   : > { %v1407_v53 = vsel %vm812_vm1, %v2145_v51, 0.0 }
 0x99e   : > { %2146 = vpow2.f32 %v1401_v52  ;;  %1408 = vadd.xlane.f32.xlu0 %v1407_v53 }
 0x9a1   : > { %v1391_v54 = vpop.xlane.xlu2 %1390 }
 0x9a2   : > { %v1397_v55 = vsub.f32 %v1381_v36, %v1391_v54 }
 0x9a4   : > { %v2147_v56 = vpop.eup %2146  ;;  %v1403_v57 = vmul.f32 1.442695, %v1397_v55 }
 0x9a5   : > { %v1410_v35 = vsel %vm812_vm1, %v2147_v56, 0.0 }
 0x9a6   : > { %2148 = vpow2.f32 %v1403_v57  ;;  %1411 = vadd.xlane.f32.xlu0 %v1410_v35 }
 0x9a9   : > { %v2081_v10 = vpop.permute.xlu2 %2080  ;;  %v1394_v18 = vpop.xlane.xlu1 %1393 }
 0x9aa   : > { %v2082_v59 = vunpack.i.l.bf16 %v2081_v10  ;;  %v1398_v60 = vsub.f32 %v1382_v42, %v1394_v18  ;;  %v2083_v16 = vunpack.i.h.bf16 %v2081_v10  ;;  %v1632_v18 = vld [vmem:[%s2822_s13 + $0x8] sm:$0xff] }
 0x9ab   : > { %1660 = vmatpush.msra.mxu2 %v1632_v18 }
 0x9ac   : > { %v2149_v0 = vpop.eup %2148  ;;  %v1405_v1 = vmul.f32 1.442695, %v1398_v60  ;;  %1463 = vmatpush.msrb.mxu0 %v2082_v59  ;;  %v1631_v59 = vld [vmem:[%s2822_s13] sm:$0xff] }
 0x9ad   : > { %v1413_v2 = vsel %vm812_vm1, %v2149_v0, 0.0  ;;  %1661 = vmatpush.msra.mxu2 %v1631_v59 }
 0x9ae   : > { %2150 = vpow2.f32 %v1405_v1  ;;  %1414 = vadd.xlane.f32.xlu0 %v1413_v2  ;;  %1464 = vmatpush.msrb.mxu0 %v2083_v16 }
 0x9b1   : > { %v2091_v11 = vpop.permute.xlu2 %2090 }
 0x9b2   : > { %v2093_v13 = vunpack.i.h.bf16 %v2091_v11  ;;  %v2092_v12 = vunpack.i.l.bf16 %v2091_v11 }
 0x9b4   : > { %v2151_v22 = vpop.eup %2150  ;;  %1514 = vmatpush.msra.mxu3 %v2092_v12 }
 0x9b5   : > { %v1416_v4 = vsel %vm812_vm1, %v2151_v22, 0.0 }
 0x9b6   : > { %1417 = vadd.xlane.f32.xlu0 %v1416_v4  ;;  %1515 = vmatpush.msra.mxu3 %v2093_v13  ;;  %v2706_v13 = vld [vmem:[%s2824_s15] sm:$0x3f] }
 0x9c1   : > { %v2086_v5 = vpop.permute.xlu1 %2085 }
 0x9c2   : > { %v2087_v8 = vunpack.i.l.bf16 %v2086_v5  ;;  %v2088_v3 = vunpack.i.h.bf16 %v2086_v5 }
 0x9c4   : > { %1465 = vmatpush.msrb.mxu0 %v2087_v8 }
 0x9c6   : > { %1466 = vmatpush.msrb.mxu0 %v2088_v3 }
 0xa11   : > { %v1409_v9 = vpop.xlane.xlu0 %1408 }
 0xa12   : > { %2152 = vrcp.f32 %v1409_v9 }
 0xa18   : > { %v2153_v15 = vpop.eup %2152 }
 0xa19   : > { %v1423_v17 = vmul.f32 %v2153_v15, %v2145_v51  ;;  %v1412_v7 = vpop.xlane.xlu0 %1411 }
 0xa1a   : > { %2154 = vrcp.f32 %v1412_v7 }
 0xa1b   : > { %1990 = vmatmul.msk.f32.vlgmr.msrb.gmra.mxu0 %vm812_vm1, %v1423_v17 }
 0xa20   : > { %v2155_v19 = vpop.eup %2154 }
 0xa21   : > { %v1415_v20 = vpop.xlane.xlu0 %1414  ;;  %v1424_v21 = vmul.f32 %v2155_v19, %v2147_v56 }
 0xa22   : > { %2156 = vrcp.f32 %v1415_v20  ;;  %v1621_v20 = vperm.slane %v2706_v13, 2 }
 0xa23   : > { %1991 = vmatmul.msk.f32.gmra.mxu0 %vm812_vm1, %v1424_v21  ;;  %v1680_v21 = vld [vmem:[%s2823_s14 + $0x8] sm:$0xff] }
 0xa24   : > { %1708 = vmatpush.msra.mxu1 %v1680_v21 }
 0xa28   : > { %v2157_v23 = vpop.eup %2156 }
 0xa29   : > { %v1418_v25 = vpop.xlane.xlu0 %1417  ;;  %v1425_v26 = vmul.f32 %v2157_v23, %v2149_v0 }
 0xa2a   : > { %2158 = vrcp.f32 %v1418_v25 }
 0xa2b   : > { %1992 = vmatmul.msk.f32.gmra.mxu0 %vm812_vm1, %v1425_v26 }
 0xa30   : > { %v2159_v27 = vpop.eup %2158 }
 0xa31   : > { %v1426_v28 = vmul.f32 %v2159_v27, %v2151_v22  ;;  %v1626_v27 = vperm.slane %v2706_v13, 3 }
 0xa33   : > { %1993 = vmatmul.msk.f32.gmra.mxu0 %vm812_vm1, %v1426_v28 }
 0xa98   : > { %v1468_v29 = vpop.f32.mrf.mxu0 }
 0xa99   : > { %1994 = vmatmul.msk.f32.vlgmr.msra.gmra.mxu3 %vm705_vm0, %v1468_v29 }
 0xaa0   : > { %v1471_v31 = vpop.f32.mrf.mxu0 }
 0xaa1   : > { %1995 = vmatmul.msk.f32.gmra.mxu3 %vm705_vm0, %v1471_v31 }
 0xaa8   : > { %v1474_v24 = vpop.f32.mrf.mxu0 }
 0xaa9   : > { %1996 = vmatmul.msk.f32.gmra.mxu3 %vm705_vm0, %v1474_v24 }
 0xab0   : > { %v1477_v61 = vpop.f32.mrf.mxu0 }
 0xab1   : > { %1997 = vmatmul.msk.f32.gmra.mxu3 %vm705_vm0, %v1477_v61 }
 0xb1c   : > { %v1517_v62 = vpop.f32.mrf.mxu3 }
 0xb1d   : > { %v1529_v63 = vadd.f32 %v1517_v62, %v2592_v40 }
 0xb1f   : > { %v1533_v32 = vsel %vm705_vm0, %v1529_v63, 0.0 }
 0xb20   : > { %1534 = vadd.xlane.f32.xlu0 %v1533_v32 }
 0xb24   : > { %v1520_v33 = vpop.f32.mrf.mxu3 }
 0xb25   : > { %v1530_v34 = vadd.f32 %v1520_v33, %v2600_v58 }
 0xb27   : > { %v1536_v36 = vsel %vm705_vm0, %v1530_v34, 0.0 }
 0xb28   : > { %1537 = vadd.xlane.f32.xlu1 %v1536_v36 }
 0xb2c   : > { %v1523_v37 = vpop.f32.mrf.mxu3 }
 0xb2d   : > { %v1531_v38 = vadd.f32 %v1523_v37, %v2608_v30 }
 0xb2f   : > { %v1539_v39 = vsel %vm705_vm0, %v1531_v38, 0.0 }
 0xb30   : > { %1540 = vadd.xlane.f32.xlu2 %v1539_v39 }
 0xb34   : > { %v1526_v41 = vpop.f32.mrf.mxu3 }
 0xb35   : > { %v1532_v42 = vadd.f32 %v1526_v41, %v2616_v14 }
 0xb37   : > { %v1542_v40 = vsel %vm705_vm0, %v1532_v42, 0.0 }
 0xb38   : > { %1543 = vadd.xlane.f32.xlu0 %v1542_v40 }
 0xb93   : > { %v1535_v43 = vpop.xlane.xlu0 %1534 }
 0xb94   : > { %v1545_v44 = vmul.f32 %v1535_v43, %v2487_v6 }
 0xb96   : > { %v1549_v45 = vsub.f32 %v1529_v63, %v1545_v44 }
 0xb98   : > { %v1553_v58 = vmul.f32 %v1549_v45, %v1549_v45 }
 0xb9a   : > { %v1557_v46 = vsel %vm705_vm0, %v1553_v58, 0.0 }
 0xb9b   : > { %v1538_v47 = vpop.xlane.xlu1 %1537  ;;  %1558 = vadd.xlane.f32.xlu0 %v1557_v46 }
 0xb9c   : > { %v1546_v30 = vmul.f32 %v1538_v47, %v2487_v6 }
 0xb9e   : > { %v2677_v48 = vsub.f32 %v1530_v34, %v1546_v30 }
 0xba0   : > { %v1554_v49 = vmul.f32 %v2677_v48, %v2677_v48 }
 0xba2   : > { %v1560_v14 = vsel %vm705_vm0, %v1554_v49, 0.0 }
 0xba3   : > { %v1541_v50 = vpop.xlane.xlu2 %1540  ;;  %1561 = vadd.xlane.f32.xlu0 %v1560_v14 }
 0xba4   : > { %v1547_v51 = vmul.f32 %v1541_v50, %v2487_v6 }
 0xba6   : > { %v2683_v52 = vsub.f32 %v1531_v38, %v1547_v51 }
 0xba8   : > { %v1555_v53 = vmul.f32 %v2683_v52, %v2683_v52 }
 0xbaa   : > { %v1563_v54 = vsel %vm705_vm0, %v1555_v53, 0.0 }
 0xbab   : > { %1564 = vadd.xlane.f32.xlu0 %v1563_v54  ;;  %v1544_v55 = vpop.xlane.xlu0 %1543 }
 0xbac   : > { %v1548_v56 = vmul.f32 %v1544_v55, %v2487_v6 }
 0xbae   : > { %v2689_v57 = vsub.f32 %v1532_v42, %v1548_v56  ;;  %v1633_v56 = vperm.slane %v2706_v13, 0 }
 0xbb0   : > { %v1556_v35 = vmul.f32 %v2689_v57, %v2689_v57 }
 0xbb2   : > { %v1566_v10 = vsel %vm705_vm0, %v1556_v35, 0.0 }
 0xbb3   : > { %1567 = vadd.xlane.f32.xlu0 %v1566_v10 }
 0xc0e   : > { %v1559_v60 = vpop.xlane.xlu0 %1558 }
 0xc0f   : > { %v1569_v0 = vmul.f32 %v1559_v60, %v2487_v6 }
 0xc11   : > { %v1573_v16 = vadd.f32 1e-05, %v1569_v0 }
 0xc13   : > { %2160 = vrsqrt.f32 %v1573_v16  ;;  %vm1583_vm14 = vweird.f32 %v1573_v16 }
 0xc16   : > { %v1562_v1 = vpop.xlane.xlu0 %1561 }
 0xc17   : > { %v1570_v2 = vmul.f32 %v1562_v1, %v2487_v6 }
 0xc19   : > { %v2161_v22 = vpop.eup %2160  ;;  %v1574_v4 = vadd.f32 1e-05, %v1570_v2 }
 0xc1a   : > { %v1578_v5 = vmul.f32 %v2161_v22, %v1573_v16  ;;  %vm1584_vm13 = vweird.f32 %v2161_v22 }
 0xc1b   : > { %2162 = vrsqrt.f32 %v1574_v4  ;;  %vm1585_vm15 = vmor %vm1583_vm14, %vm1584_vm13  ;;  %vm1593_vm3 = vweird.f32 %v1574_v4 }
 0xc1c   : > { %v1579_v8 = vmul.f32 %v2161_v22, %v1578_v5  ;;  %v1681_v5 = vperm.slane %v2706_v13, 1 }
 0xc1e   : > { %v1580_v3 = vmul.f32 0.5, %v1579_v8  ;;  %v1565_v9 = vpop.xlane.xlu0 %1564 }
 0xc1f   : > { %v1571_v11 = vmul.f32 %v1565_v9, %v2487_v6 }
 0xc20   : > { %v1581_v12 = vsub.f32 1.5, %v1580_v3 }
 0xc21   : > { %v2163_v15 = vpop.eup %2162  ;;  %v1575_v17 = vadd.f32 1e-05, %v1571_v11 }
 0xc22   : > { %v1582_v7 = vmul.f32 %v2161_v22, %v1581_v12  ;;  %v1588_v19 = vmul.f32 %v2163_v15, %v1574_v4  ;;  %vm1594_vm2 = vweird.f32 %v2163_v15 }
 0xc23   : > { %2164 = vrsqrt.f32 %v1575_v17  ;;  %vm1595_vm4 = vmor %vm1593_vm3, %vm1594_vm2  ;;  %vm1603_vm6 = vweird.f32 %v1575_v17 }
 0xc24   : > { %v1586_v23 = vsel %vm1585_vm15, %v2161_v22, %v1582_v7  ;;  %v1589_v25 = vmul.f32 %v2163_v15, %v1588_v19 }
 0xc25   : > { %v1617_v26 = vmul.f32 %v1586_v23, %v1549_v45 }
 0xc26   : > { %v1590_v28 = vmul.f32 0.5, %v1589_v25  ;;  %v1568_v29 = vpop.xlane.xlu0 %1567 }
 0xc27   : > { %v1622_v31 = vmul.f32 %v1621_v20, %v1617_v26  ;;  %v1572_v24 = vmul.f32 %v1568_v29, %v2487_v6  ;;  %v1829_v29 = vld [vmem:[%s553_s19] sm:$0x1]  ;;  %s1856_s19 = scalar_lea.hbm %s2825_s16, %s2007_s30 }
 0xc28   : > { %v1591_v61 = vsub.f32 1.5, %v1590_v28 }
 0xc29   : > { %v2165_v62 = vpop.eup %2164  ;;  %v1576_v63 = vadd.f32 1e-05, %v1572_v24  ;;  %v1627_v32 = vadd.f32 %v1626_v27, %v1622_v31 }
 0xc2a   : > { %v1592_v33 = vmul.f32 %v2163_v15, %v1591_v61  ;;  %v1598_v34 = vmul.f32 %v2165_v62, %v1575_v17  ;;  %vm1604_vm5 = vweird.f32 %v2165_v62 }
 0xc2b   : > { %2166 = vrsqrt.f32 %v1576_v63  ;;  %1998 = vmatmul.msk.f32.vlgmr.msra.gmra.mxu2 %vm705_vm0, %v1627_v32  ;;  %vm1605_vm7 = vmor %vm1603_vm6, %vm1604_vm5  ;;  %vm1613_vm9 = vweird.f32 %v1576_v63 }
 0xc2c   : > { %v1596_v36 = vsel %vm1595_vm4, %v2163_v15, %v1592_v33  ;;  %v1599_v37 = vmul.f32 %v2165_v62, %v1598_v34 }
 0xc2d   : > { %v1618_v38 = vmul.f32 %v1596_v36, %v2677_v48 }
 0xc2e   : > { %v1600_v39 = vmul.f32 0.5, %v1599_v37 }
 0xc2f   : > { %v1623_v41 = vmul.f32 %v1621_v20, %v1618_v38 }
 0xc30   : > { %v1601_v42 = vsub.f32 1.5, %v1600_v39 }
 0xc31   : > { %v2167_v40 = vpop.eup %2166  ;;  %v1628_v43 = vadd.f32 %v1626_v27, %v1623_v41 }
 0xc32   : > { %v1602_v44 = vmul.f32 %v2165_v62, %v1601_v42  ;;  %v1608_v45 = vmul.f32 %v2167_v40, %v1576_v63  ;;  %vm1614_vm8 = vweird.f32 %v2167_v40 }
 0xc33   : > { %1999 = vmatmul.msk.f32.gmra.mxu2 %vm705_vm0, %v1628_v43  ;;  %vm1615_vm10 = vmor %vm1613_vm9, %vm1614_vm8 }
 0xc34   : > { %v1606_v58 = vsel %vm1605_vm7, %v2165_v62, %v1602_v44  ;;  %v1609_v46 = vmul.f32 %v2167_v40, %v1608_v45 }
 0xc35   : > { %v1619_v47 = vmul.f32 %v1606_v58, %v2683_v52  ;;  %v1679_v52 = vld [vmem:[%s2823_s14] sm:$0xff] }
 0xc36   : > { %v1610_v30 = vmul.f32 0.5, %v1609_v46  ;;  %1709 = vmatpush.msra.mxu1 %v1679_v52 }
 0xc37   : > { %v1624_v49 = vmul.f32 %v1621_v20, %v1619_v47 }
 0xc38   : > { %v1611_v14 = vsub.f32 1.5, %v1610_v30 }
 0xc39   : > { %v1629_v48 = vadd.f32 %v1626_v27, %v1624_v49  ;;  %v1830_v49 = vld [vmem:[%s2816_s7] sm:$0x1] }
 0xc3a   : > { %v1612_v50 = vmul.f32 %v2167_v40, %v1611_v14 }
 0xc3b   : > { %2000 = vmatmul.msk.f32.gmra.mxu2 %vm705_vm0, %v1629_v48 }
 0xc3c   : > { %v1616_v51 = vsel %vm1615_vm10, %v2167_v40, %v1612_v50 }
 0xc3d   : > { %v1620_v53 = vmul.f32 %v1616_v51, %v2689_v57 }
 0xc3f   : > { %v1625_v54 = vmul.f32 %v1621_v20, %v1620_v53 }
 0xc41   : > { %v1630_v55 = vadd.f32 %v1626_v27, %v1625_v54 }
 0xc43   : > { %2001 = vmatmul.msk.f32.gmra.mxu2 %vm705_vm0, %v1630_v55 }
 0xcae   : > { %v1663_v35 = vpop.f32.mrf.mxu2 }
 0xcaf   : > { %v1664_v10 = vadd.f32 %v1663_v35, %v1633_v56 }
 0xcb1   : > { %v1675_v18 = vmax.f32 %v1664_v10, 0.0 }
 0xcb3   : > { %2002 = vmatmul.msk.f32.vlgmr.msra.gmra.mxu1 %vm705_vm0, %v1675_v18 }
 0xcb6   : > { %v1666_v59 = vpop.f32.mrf.mxu2 }
 0xcb7   : > { %v1667_v60 = vadd.f32 %v1666_v59, %v1633_v56 }
 0xcb9   : > { %v1676_v0 = vmax.f32 %v1667_v60, 0.0 }
 0xcbb   : > { %2003 = vmatmul.msk.f32.gmra.mxu1 %vm705_vm0, %v1676_v0 }
 0xcbe   : > { %v1669_v57 = vpop.f32.mrf.mxu2 }
 0xcbf   : > { %v1670_v16 = vadd.f32 %v1669_v57, %v1633_v56 }
 0xcc1   : > { %v1677_v1 = vmax.f32 %v1670_v16, 0.0 }
 0xcc3   : > { %2004 = vmatmul.msk.f32.gmra.mxu1 %vm705_vm0, %v1677_v1 }
 0xcc6   : > { %v1672_v2 = vpop.f32.mrf.mxu2 }
 0xcc7   : > { %v1673_v22 = vadd.f32 %v1672_v2, %v1633_v56 }
 0xcc9   : > { %v1678_v4 = vmax.f32 %v1673_v22, 0.0 }
 0xccb   : > { %2005 = vmatmul.msk.f32.gmra.mxu1 %vm705_vm0, %v1678_v4 }
 0xd30   : > { %v1711_v8 = vpop.f32.mrf.mxu1 }
 0xd31   : > { %v1712_v3 = vadd.f32 %v1711_v8, %v1681_v5 }
 0xd33   : > { %v1723_v9 = vadd.f32 %v1712_v3, %v1627_v32 }
 0xd35   : > { %v1727_v11 = vsel %vm705_vm0, %v1723_v9, 0.0 }
 0xd36   : > { %1728 = vadd.xlane.f32.xlu1 %v1727_v11 }
 0xd38   : > { %v1714_v12 = vpop.f32.mrf.mxu1 }
 0xd39   : > { %v1715_v15 = vadd.f32 %v1714_v12, %v1681_v5 }
 0xd3b   : > { %v1724_v17 = vadd.f32 %v1715_v15, %v1628_v43 }
 0xd3d   : > { %v1730_v7 = vsel %vm705_vm0, %v1724_v17, 0.0 }
 0xd3e   : > { %1731 = vadd.xlane.f32.xlu2 %v1730_v7 }
 0xd40   : > { %v1717_v19 = vpop.f32.mrf.mxu1 }
 0xd41   : > { %v1718_v20 = vadd.f32 %v1717_v19, %v1681_v5 }
 0xd43   : > { %v1725_v21 = vadd.f32 %v1718_v20, %v1629_v48 }
 0xd45   : > { %v1733_v23 = vsel %vm705_vm0, %v1725_v21, 0.0 }
 0xd46   : > { %1734 = vadd.xlane.f32.xlu0 %v1733_v23 }
 0xd48   : > { %v1720_v25 = vpop.f32.mrf.mxu1 }
 0xd49   : > { %v1721_v26 = vadd.f32 %v1720_v25, %v1681_v5 }
 0xd4b   : > { %v1726_v27 = vadd.f32 %v1721_v26, %v1630_v55 }
 0xd4d   : > { %v1736_v28 = vsel %vm705_vm0, %v1726_v27, 0.0 }
 0xd4e   : > { %1737 = vadd.xlane.f32.xlu1 %v1736_v28 }
 0xd56   : > { %1833 = vperm.xlu2 %2063, %v1829_v29   ;;  %v1815_v29 = vperm.slane %v2706_v13, 4 }
 0xda9   : > { %v1729_v31 = vpop.xlane.xlu1 %1728 }
 0xdaa   : > { %v1739_v24 = vmul.f32 %v1729_v31, %v2487_v6 }
 0xdac   : > { %v2739_v61 = vsub.f32 %v1723_v9, %v1739_v24 }
 0xdae   : > { %v1747_v62 = vmul.f32 %v2739_v61, %v2739_v61 }
 0xdb0   : > { %v1751_v63 = vsel %vm705_vm0, %v1747_v62, 0.0 }
 0xdb1   : > { %v1732_v32 = vpop.xlane.xlu2 %1731  ;;  %1752 = vadd.xlane.f32.xlu0 %v1751_v63 }
 0xdb2   : > { %v1740_v33 = vmul.f32 %v1732_v32, %v2487_v6 }
 0xdb4   : > { %v2745_v34 = vsub.f32 %v1724_v17, %v1740_v33 }
 0xdb6   : > { %v1748_v36 = vmul.f32 %v2745_v34, %v2745_v34 }
 0xdb8   : > { %v1754_v37 = vsel %vm705_vm0, %v1748_v36, 0.0 }
 0xdb9   : > { %1755 = vadd.xlane.f32.xlu1 %v1754_v37  ;;  %v1735_v38 = vpop.xlane.xlu0 %1734  ;;  %v1834_v46 = vpop.permute.xlu2 %1833  ;;  %v1820_v37 = vperm.slane %v2706_v13, 5 }
 0xdba   : > { %v1741_v39 = vmul.f32 %v1735_v38, %v2487_v6  ;;  %v1836_v30 = vperm.slane %v1834_v46, 0 }
 0xdbc   : > { %v2751_v41 = vsub.f32 %v1725_v21, %v1741_v39  ;;  %v1837_v14 = vmul.f32 %v1836_v30, %v1830_v49 }
 0xdbe   : > { %v1749_v42 = vmul.f32 %v2751_v41, %v2751_v41  ;;  %v1839_v48 = vperm.slane %v1837_v14, 0 }
 0xdc0   : > { %v1757_v40 = vsel %vm705_vm0, %v1749_v42, 0.0 }
 0xdc1   : > { %v1738_v43 = vpop.xlane.xlu1 %1737  ;;  %1758 = vadd.xlane.f32.xlu0 %v1757_v40 }
 0xdc2   : > { %v1742_v44 = vmul.f32 %v1738_v43, %v2487_v6 }
 0xdc4   : > { %v2757_v45 = vsub.f32 %v1726_v27, %v1742_v44 }
 0xdc6   : > { %v1750_v58 = vmul.f32 %v2757_v45, %v2757_v45 }
 0xdc8   : > { %v1760_v47 = vsel %vm705_vm0, %v1750_v58, 0.0 }
 0xdc9   : > { %1761 = vadd.xlane.f32.xlu1 %v1760_v47 }
 0xdd5   : > { %1840 = vrot.lane.b32.xlu0 %v1839_v48, %s2245_s28  ;;  %s1860_s28 = sshll.u32 %s1856_s19, 4  ;;  %s1861_s28 = int_to_ptr.hbm [resolvable:$true] %s1860_s28 }
 0xdd6   : > { %s2190_s1 = sshra.s32 %s1861_s28, 4  ;;  %s2191_s1 = int_to_ptr.hbm [resolvable:$true] %s2190_s1 }
 0xdd7   : > { %s2192_s26 = scalar_lea.hbm %s2191_s1, 8  ;;  %p2197_p0 = scmp.lt.s32.totalorder %s2191_s1, %s2825_s16 }
 0xdd8   : > { %p2193_p11 = scmp.ne.s32.totalorder %s2191_s1, %s2192_s26  ;;  %p2198_p1 = scmp.lt.s32.totalorder %s2196_s29, %s2192_s26 }
 0xdda   : > { %p2194_p12 = pnand %p2193_p11, %p2369_p5  ;;  %p2199_p2 = por %p2198_p1, %p2197_p0 }
 0xddc   : > { %p2195_p13 = pneg %p2194_p12 }
 0xdde   : > { %p2200_p3 = pnand %p2199_p2, %p2195_p13 }
 0xe24   : > { %v1753_v50 = vpop.xlane.xlu0 %1752 }
 0xe25   : > { %v1763_v51 = vmul.f32 %v1753_v50, %v2487_v6 }
 0xe27   : > { %v1767_v53 = vadd.f32 1e-05, %v1763_v51 }
 0xe29   : > { %2168 = vrsqrt.f32 %v1767_v53  ;;  %vm1777_vm15 = vweird.f32 %v1767_v53 }
 0xe2c   : > { %v1756_v54 = vpop.xlane.xlu1 %1755 }
 0xe2d   : > { %v1764_v55 = vmul.f32 %v1756_v54, %v2487_v6 }
 0xe2f   : > { %v1768_v52 = vadd.f32 1e-05, %v1764_v55  ;;  %v2169_v56 = vpop.eup %2168 }
 0xe30   : > { %v1772_v35 = vmul.f32 %v2169_v56, %v1767_v53  ;;  %vm1778_vm12 = vweird.f32 %v2169_v56 }
 0xe31   : > { %2170 = vrsqrt.f32 %v1768_v52  ;;  %vm1787_vm13 = vweird.f32 %v1768_v52  ;;  %vm1779_vm3 = vmor %vm1777_vm15, %vm1778_vm12 }
 0xe32   : > { %v1773_v0 = vmul.f32 %v2169_v56, %v1772_v35 }
 0xe34   : > { %v1759_v10 = vpop.xlane.xlu0 %1758  ;;  %v1774_v1 = vmul.f32 0.5, %v1773_v0 }
 0xe35   : > { %v1765_v18 = vmul.f32 %v1759_v10, %v2487_v6 }
 0xe36   : > { %v1775_v9 = vsub.f32 1.5, %v1774_v1 }
 0xe37   : > { %v2171_v59 = vpop.eup %2170  ;;  %v1769_v60 = vadd.f32 1e-05, %v1765_v18 }
 0xe38   : > { %v1782_v57 = vmul.f32 %v2171_v59, %v1768_v52  ;;  %vm1788_vm11 = vweird.f32 %v2171_v59  ;;  %v1776_v17 = vmul.f32 %v2169_v56, %v1775_v9 }
 0xe39   : > { %2172 = vrsqrt.f32 %v1769_v60  ;;  %vm1789_vm14 = vmor %vm1787_vm13, %vm1788_vm11  ;;  %vm1797_vm4 = vweird.f32 %v1769_v60 }
 0xe3a   : > { %v1783_v16 = vmul.f32 %v2171_v59, %v1782_v57 }
 0xe3c   : > { %v1784_v2 = vmul.f32 0.5, %v1783_v16  ;;  %v1762_v22 = vpop.xlane.xlu1 %1761 }
 0xe3d   : > { %v1766_v4 = vmul.f32 %v1762_v22, %v2487_v6  ;;  %v1780_v6 = vsel %vm1779_vm3, %v2169_v56, %v1776_v17 }
 0xe3e   : > { %v1785_v5 = vsub.f32 1.5, %v1784_v2  ;;  %v1811_v31 = vmul.f32 %v1780_v6, %v2739_v61 }
 0xe3f   : > { %v2173_v8 = vpop.eup %2172  ;;  %v1770_v3 = vadd.f32 1e-05, %v1766_v4 }
 0xe40   : > { %v1792_v11 = vmul.f32 %v2173_v8, %v1769_v60  ;;  %v1786_v12 = vmul.f32 %v2171_v59, %v1785_v5  ;;  %vm1798_vm2 = vweird.f32 %v2173_v8  ;;  %v1816_v33 = vmul.f32 %v1815_v29, %v1811_v31 }
 0xe41   : > { %2174 = vrsqrt.f32 %v1770_v3  ;;  %vm1799_vm5 = vmor %vm1797_vm4, %vm1798_vm2  ;;  %vm1807_vm7 = vweird.f32 %v1770_v3 }
 0xe42   : > { %v1793_v15 = vmul.f32 %v2173_v8, %v1792_v11  ;;  %v1790_v19 = vsel %vm1789_vm14, %v2171_v59, %v1786_v12  ;;  %v1821_v61 = vadd.f32 %v1820_v37, %v1816_v33 }
 0xe43   : > { %v1812_v26 = vmul.f32 %v1790_v19, %v2745_v34 }
 0xe44   : > { %v1794_v7 = vmul.f32 0.5, %v1793_v15 }
 0xe45   : > { %v1817_v63 = vmul.f32 %v1815_v29, %v1812_v26 }
 0xe46   : > { %v1795_v20 = vsub.f32 1.5, %v1794_v7 }
 0xe47   : > { %v2175_v21 = vpop.eup %2174  ;;  %v1822_v38 = vadd.f32 %v1820_v37, %v1817_v63  ;;  %v1841_v47 = vpop.permute.xlu0 %1840 }
 0xe48   : > { %v1796_v23 = vmul.f32 %v2173_v8, %v1795_v20  ;;  %v1802_v25 = vmul.f32 %v2175_v21, %v1770_v3  ;;  %vm1808_vm6 = vweird.f32 %v2175_v21 }
 0xe49   : > { %vm1809_vm8 = vmor %vm1807_vm7, %vm1808_vm6  ;;  %v1825_v43 = vadd.f32 %v1822_v38, %v1821_v61 }
 0xe4a   : > { %v1800_v27 = vsel %vm1799_vm5, %v2173_v8, %v1796_v23  ;;  %v1803_v28 = vmul.f32 %v2175_v21, %v1802_v25 }
 0xe4b   : > { %v1813_v24 = vmul.f32 %v1800_v27, %v2751_v41 }
 0xe4c   : > { %v1804_v62 = vmul.f32 0.5, %v1803_v28 }
 0xe4d   : > { %v1818_v36 = vmul.f32 %v1815_v29, %v1813_v24 }
 0xe4e   : > { %v1805_v32 = vsub.f32 1.5, %v1804_v62 }
 0xe4f   : > { %v1823_v40 = vadd.f32 %v1820_v37, %v1818_v36 }
 0xe50   : > { %v1806_v34 = vmul.f32 %v2175_v21, %v1805_v32 }
 0xe51   : > { %v1826_v13 = vadd.f32 %v1825_v43, %v1823_v40 }
 0xe52   : > { %v1810_v39 = vsel %vm1809_vm8, %v2175_v21, %v1806_v34 }
 0xe53   : > { %v1814_v42 = vmul.f32 %v1810_v39, %v2757_v45 }
 0xe55   : > { %v1819_v41 = vmul.f32 %v1815_v29, %v1814_v42 }
 0xe57   : > { %v1824_v44 = vadd.f32 %v1820_v37, %v1819_v41 }
 0xe59   : > { %v1827_v58 = vadd.f32 %v1826_v13, %v1824_v44 }
 0xe5b   : > { %v1828_v46 = vmul.f32 0.25, %v1827_v58 }
 0xe5d   : > { %v1843_v45 = vsel %vm705_vm0, %v1828_v46, %v1841_v47 }
 0xe5e   : > { %1844 = vst.msk [vmem:[%s540_s18] sm:$0xff] %vm812_vm1, %v1843_v45 }
 0xe5f   : > { %2203 = shalt.err (!%p2200_p3)
}
 0xe60   : > { %2016 = dma.vmem_to_hbm [thread:$0]  (%p2369_p5), %s1859_s20, 128, %s1861_s28, %s1846_s25  }
 0xe61 PF: > { %p2022_p4 = scmp.ge.s32.totalorder %s2238_s24, 2  ;;  %s1872_s27 = sand.u32 1, %s2226_s21  }
 0xe62   : > { %s1873_s18 = scalar_lea.sflag [#allocation3], %s1872_s27 }
 0xe63   : > { %p2019_p7 = pnand %p2022_p4, %p2373_p6 }
 0xe65   : > { %p2020_p8 = pneg %p2019_p7 }
 0xe67   : > { %2221 = dma.done.wait (%p2020_p8), %s1873_s18, 128  }
 0xe68   : > { %2223 = vsyncadd (%p2020_p8), %s1873_s18, 4294967168  ;;  %s2840_s24 = sld [smem:[#allocation6_spill]]  ;;  %s2843_s21 = smov %s2230_s22 }
 0xe69   : > { %s2841_s1 = sld [smem:[#allocation5_spill]] }
 0xe6a   : > { %s2842_s23 = sld [smem:[#allocation7_spill]] }
 0xe6e   : > { %p26_p9 = scmp.ge.s32.totalorder %s2840_s24, 4  }
 0xe6f   : > { %s2844_s22 = smov %s2841_s1 }
 0xe70   :  { %28 = sbr.rel (!%p26_p9) target bundleno = 7 (0x7), region = 125 }
 0xe75   :  { %1879 = vsyncpa [#allocation3], 1 }
 0xe76   :  { %1881 = vsyncpa [#allocation3 + $0x1], 1 }

</bundles_post_ra>
